<compile_context>
chip_gen: v6e
topology: v6e:2x2x1
jax: 0.10.0
libtpu: 0.0.40
codegen_flags: <defaults>
</compile_context>

<pallas_src>
import functools

import numpy as np
import jax
import jax.numpy as jnp
from jax.experimental import pallas as pl
from jax.experimental.pallas import tpu as pltpu


def _silu(v):
    return v * jax.nn.sigmoid(v)


# ----------------------------------------------------------------------------
# Pallas kernel: B images fused per grid step, full MBConv block.
# ----------------------------------------------------------------------------
def mbconv_kernel(x_ref, w1_ref, b1_ref, wd_ref, bd_ref, mask_ref,
                  wse1_ref, wse2_ref, seg_ref, gex_ref, w3_ref, b3_ref,
                  o_ref, *scratch,
                  k_size, stride, use_residual, H, W, B):
    K = k_size
    P = (K - 1) // 2
    HW = H * W
    Ho = (H + 2 * P - K) // stride + 1
    Wo = (W + 2 * P - K) // stride + 1
    HoWo = Ho * Wo
    NHW = B * HW

    x = x_ref[...]                                              # (Cin, B*HW) bf16

    # ---- expand: 1x1 conv (+ folded BN) + SiLU.  MXU matmul, bf16 operands,
    #      f32 accumulation; channels on sublanes, fused images*HW lane-dense.
    xe = jnp.dot(w1_ref[...], x,
                 preferred_element_type=jnp.float32) + b1_ref[...]
    xe = _silu(xe)                                              # (Cexp, B*HW) f32

    # ---- depthwise KxK conv (+ folded BN) + SiLU.
    # Each spatial tap is a static lane rotation of xe (XLU slot; no staging
    # buffer, no unaligned value slices).  The precomputed 0/1 masks zero out
    # out-of-image positions, including wrap-around across image boundaries on
    # the fused B*HW lane axis.  Accumulator is seeded by the first tap.
    acc = None
    for dh in range(K):
        for dw in range(K):
            tap = dh * K + dw
            off = (dh - P) * W + (dw - P)                       # flattened tap offset
            w_tap = wd_ref[:, tap:tap + 1]                      # (Cexp, 1) per-channel
            if off == 0:
                contrib = xe * w_tap                            # centre tap: always valid
            else:
                win = pltpu.roll(xe, shift=(-off) % NHW, axis=1)
                contrib = (win * mask_ref[tap:tap + 1, :]) * w_tap
            acc = contrib if acc is None else acc + contrib     # (Cexp, B*HW) f32

    if stride != 1:
        # Decimate the full-resolution taps to the strided output grid with
        # strided lane reads from a scratch copy (no dense decimation matmul).
        # TODO(synk): production stride-2 blocks should use an H-tiled grid
        #             with a +/-P halo instead of full-image decimation.
        dw_scr = scratch[0]
        dw_scr[...] = acc
        rows = []
        for n in range(B):
            for ho in range(Ho):
                start = n * HW + ho * stride * W
                rows.append(dw_scr[:, pl.ds(start, Wo, stride=stride)])
        acc = jnp.concatenate(rows, axis=1)                     # (Cexp, B*HoWo)

    xd = _silu(acc + bd_ref[...])                               # (Cexp, B*HoWo) f32

    # ---- squeeze-excitation.  Per-image pooling and the gate broadcast are
    # tiny one-hot bf16 MXU matmuls (MXU has slack); SE weights are laid out
    # with Cexp on the lane axis.
    xd_bf = xd.astype(jnp.bfloat16)
    pooled = jnp.dot(xd_bf, seg_ref[...],
                     preferred_element_type=jnp.float32) * (1.0 / HoWo)   # (Cexp, B)
    y1 = _silu(jnp.dot(wse1_ref[...], pooled.astype(jnp.bfloat16),
                       preferred_element_type=jnp.float32))               # (Cred, B)
    gate = jax.nn.sigmoid(jnp.dot(wse2_ref[...], y1.astype(jnp.bfloat16),
                                  preferred_element_type=jnp.float32))    # (Cexp, B)
    gate_full = jnp.dot(gate.astype(jnp.bfloat16), gex_ref[...],
                        preferred_element_type=jnp.float32)               # (Cexp, B*HoWo)
    xs = (xd * gate_full).astype(jnp.bfloat16)

    # ---- pointwise: 1x1 conv (+ folded BN), no activation.  MXU, bf16 operands.
    out = jnp.dot(w3_ref[...], xs,
                  preferred_element_type=jnp.float32) + b3_ref[...]       # (Cout, B*HoWo)

    if use_residual:
        # TODO(synk): the original adds `self.expand.conv.quant_skip` (stashed by
        # the custom quantized conv); approximated with the block input (standard
        # residual).  StochasticDepth is identity at inference.
        out = out + x.astype(jnp.float32)

    o_ref[...] = out.astype(o_ref.dtype)


# ----------------------------------------------------------------------------
# Wrapper
# ----------------------------------------------------------------------------
def _vmem_limit_bytes():
    # v7x has 64 MiB physical VMEM per TensorCore; older generations have 128 MiB.
    try:
        kind = jax.devices()[0].device_kind.lower()
    except Exception:
        kind = ""
    return (32 if "7" in kind else 64) * 1024 * 1024


def _pick_images_per_step(N, HW, Cexp):
    # Fuse several images' worth of lanes per grid step so the matmul N-dim and
    # the output store are wide and lane-dense (amortizes ~0.35us per-step
    # overhead), capped by a rough per-step live-activation budget.
    budget = 8 * 1024 * 1024
    per_img = 3 * Cexp * HW * 4                 # xe / tap window / acc, f32
    b = int(max(1, min(N, budget // max(per_img, 1))))
    while b > 1 and N % b != 0:
        b -= 1
    if (b * HW) % 128 != 0 and b != N:
        b = N                                   # full-array block is always legal
    return b


def mbconv_pallas(x_nchw, kparams, *, k_size, stride, use_residual):
    N, Cin, H, W = x_nchw.shape
    HW = H * W
    w1, b1, wd, bd, wse1, wse2, w3, b3 = kparams
    Cexp = w1.shape[0]
    Cred = wse1.shape[0]
    Cout = w3.shape[0]
    P = (k_size - 1) // 2
    Ho = (H + 2 * P - k_size) // stride + 1
    Wo = (W + 2 * P - k_size) // stride + 1
    HoWo = Ho * Wo

    B = _pick_images_per_step(N, HW, Cexp)
    G = N // B

    # NCHW -> (Cin, N*HW): one XLA transpose outside the kernel; inside, the
    # fused (images x spatial) axis stays lane-dense.  bf16 across the boundary
    # halves input DMA and is what the MXU consumes anyway.
    x = jnp.transpose(x_nchw.reshape(N, Cin, HW), (1, 0, 2)).reshape(Cin, N * HW)
    x = x.astype(jnp.bfloat16)

    # Per-tap border-validity masks over the fused B*HW lane axis (host-side).
    hh, ww = np.meshgrid(np.arange(H), np.arange(W), indexing="ij")
    mask_rows = []
    for dh in range(k_size):
        for dw in range(k_size):
            oh, ow = dh - P, dw - P
            m = ((hh + oh >= 0) & (hh + oh < H) &
                 (ww + ow >= 0) & (ww + ow < W))
            mask_rows.append(np.tile(m.reshape(-1), B))
    mask = jnp.asarray(np.stack(mask_rows).astype(np.float32))      # (K*K, B*HW)

    # One-hot per-image pooling / gate-broadcast matrices (exact 0/1 in bf16).
    seg_np = np.zeros((B * HoWo, B), np.float32)
    for n in range(B):
        seg_np[n * HoWo:(n + 1) * HoWo, n] = 1.0
    seg = jnp.asarray(seg_np, jnp.bfloat16)                         # (B*HoWo, B)
    gex = jnp.asarray(seg_np.T, jnp.bfloat16)                       # (B, B*HoWo)

    inputs = [x, w1, b1, wd, bd, mask, wse1, wse2, seg, gex, w3, b3]
    in_specs = [
        pl.BlockSpec((Cin, B * HW), lambda g: (0, g)),
        pl.BlockSpec((Cexp, Cin), lambda g: (0, 0)),
        pl.BlockSpec((Cexp, 1), lambda g: (0, 0)),
        pl.BlockSpec((Cexp, k_size * k_size), lambda g: (0, 0)),
        pl.BlockSpec((Cexp, 1), lambda g: (0, 0)),
        pl.BlockSpec((k_size * k_size, B * HW), lambda g: (0, 0)),
        pl.BlockSpec((Cred, Cexp), lambda g: (0, 0)),
        pl.BlockSpec((Cexp, Cred), lambda g: (0, 0)),
        pl.BlockSpec((B * HoWo, B), lambda g: (0, 0)),
        pl.BlockSpec((B, B * HoWo), lambda g: (0, 0)),
        pl.BlockSpec((Cout, Cexp), lambda g: (0, 0)),
        pl.BlockSpec((Cout, 1), lambda g: (0, 0)),
    ]

    scratch_shapes = []
    if stride != 1:
        scratch_shapes.append(pltpu.VMEM((Cexp, B * HW), jnp.float32))

    kernel = functools.partial(
        mbconv_kernel, k_size=k_size, stride=stride,
        use_residual=use_residual, H=H, W=W, B=B)

    out = pl.pallas_call(
        kernel,
        out_shape=jax.ShapeDtypeStruct((Cout, N * HoWo), jnp.float32),
        grid_spec=pltpu.PrefetchScalarGridSpec(
            num_scalar_prefetch=0,
            grid=(G,),
            in_specs=in_specs,
            out_specs=pl.BlockSpec((Cout, B * HoWo), lambda g: (0, g)),
            scratch_shapes=scratch_shapes,
        ),
        compiler_params=pltpu.CompilerParams(
            dimension_semantics=("parallel",),
            vmem_limit_bytes=_vmem_limit_bytes(),
        ),
    )(*inputs)

    # (Cout, N*HoWo) -> NCHW
    out = out.reshape(Cout, N, HoWo).transpose(1, 0, 2).reshape(N, Cout, Ho, Wo)
    return out.astype(x_nchw.dtype)


# ----------------------------------------------------------------------------
# Deterministic parameter init (PyTorch layouts) + BN folding into conv params
# ----------------------------------------------------------------------------
def init_torch_params(key, n_in, n_out, k_size, expansion_factor):
    Cexp = expansion_factor * n_in
    Cred = n_in // 4
    ks = jax.random.split(key, 8)

    def bn_params(k, c):
        k1, k2, k3, k4 = jax.random.split(k, 4)
        gamma = jax.random.uniform(k1, (c,), jnp.float32, 0.5, 1.5)
        beta = 0.1 * jax.random.normal(k2, (c,), jnp.float32)
        mean = 0.1 * jax.random.normal(k3, (c,), jnp.float32)
        var = jax.random.uniform(k4, (c,), jnp.float32, 0.5, 1.5)
        return gamma, beta, mean, var

    return dict(
        w1_t=0.2 * jax.random.normal(ks[0], (Cexp, n_in, 1, 1), jnp.float32),
        bn1=bn_params(ks[1], Cexp),
        wd_t=0.2 * jax.random.normal(ks[2], (Cexp, 1, k_size, k_size), jnp.float32),
        bnd=bn_params(ks[3], Cexp),
        wse1_t=0.2 * jax.random.normal(ks[4], (Cred, Cexp, 1, 1), jnp.float32),
        wse2_t=0.2 * jax.random.normal(ks[5], (Cexp, Cred, 1, 1), jnp.float32),
        w3_t=0.2 * jax.random.normal(ks[6], (n_out, Cexp, 1, 1), jnp.float32),
        bn3=bn_params(ks[7], n_out),
    )


def fold_bn_scale(gamma, beta, mean, var, eps=1e-5):
    scale = gamma / jnp.sqrt(var + eps)
    bias = beta - mean * scale
    return scale, bias


def torch_to_kernel_params(p, k_size):
    # expand 1x1: (Cexp, Cin, 1, 1) -> (Cexp, Cin), BN folded, bf16 MXU operand.
    s1, b1 = fold_bn_scale(*p['bn1'])
    w1 = (p['w1_t'][:, :, 0, 0] * s1[:, None]).astype(jnp.bfloat16)
    # depthwise kxk: (Cexp, 1, K, K) -> (Cexp, K*K), BN folded (f32 VPU tap path).
    sd, bd = fold_bn_scale(*p['bnd'])
    wd = (p['wd_t'][:, 0, :, :].reshape(p['wd_t'].shape[0], k_size * k_size)
          * sd[:, None])
    # SE 1x1 convs (no bias / no BN); bf16 MXU operands, Cexp on the lane axis of wse1.
    wse1 = p['wse1_t'][:, :, 0, 0].astype(jnp.bfloat16)    # (Cred, Cexp)
    wse2 = p['wse2_t'][:, :, 0, 0].astype(jnp.bfloat16)    # (Cexp, Cred)
    # pointwise 1x1: (Cout, Cexp, 1, 1) -> (Cout, Cexp), BN folded, bf16.
    s3, b3 = fold_bn_scale(*p['bn3'])
    w3 = (p['w3_t'][:, :, 0, 0] * s3[:, None]).astype(jnp.bfloat16)
    return (w1, b1.reshape(-1, 1), wd, bd.reshape(-1, 1),
            wse1, wse2, w3, b3.reshape(-1, 1))


# ----------------------------------------------------------------------------
# Plain-JAX reference (NCHW, lax.conv), matching PyTorch eval semantics
# ----------------------------------------------------------------------------
def mbconv_reference(x, p, *, k_size, stride, use_residual, eps=1e-5):
    Cexp = p['w1_t'].shape[0]
    P = (k_size - 1) // 2

    def conv2d(h, w, stride=1, padding=0, groups=1):
        return jax.lax.conv_general_dilated(
            h, w, window_strides=(stride, stride),
            padding=[(padding, padding), (padding, padding)],
            feature_group_count=groups,
            dimension_numbers=('NCHW', 'OIHW', 'NCHW'))

    def bn(h, params):
        g, b, m, v = params
        return ((h - m[None, :, None, None]) / jnp.sqrt(v[None, :, None, None] + eps)
                * g[None, :, None, None] + b[None, :, None, None])

    h = _silu(bn(conv2d(x, p['w1_t']), p['bn1']))
    h = _silu(bn(conv2d(h, p['wd_t'], stride=stride, padding=P, groups=Cexp), p['bnd']))
    y = jnp.mean(h, axis=(2, 3), keepdims=True)
    y = _silu(conv2d(y, p['wse1_t']))
    y = jax.nn.sigmoid(conv2d(y, p['wse2_t']))
    h = h * y
    h = bn(conv2d(h, p['w3_t']), p['bn3'])
    if use_residual:
        h = h + x
    return h


# ----------------------------------------------------------------------------
if __name__ == "__main__":
    # Small shapes consistent with the module.
    N, C_IN, H, W = 2, 8, 16, 16
    C_OUT = 8
    K_SIZE = 3
    STRIDE = 1
    EXPANSION = 4
    USE_RESIDUAL = (C_IN == C_OUT and STRIDE == 1)

    key = jax.random.PRNGKey(0)
    kx, kp = jax.random.split(key)
    x = jax.random.normal(kx, (N, C_IN, H, W), jnp.float32)

    torch_p = init_torch_params(kp, C_IN, C_OUT, K_SIZE, EXPANSION)
    kparams = torch_to_kernel_params(torch_p, K_SIZE)

    out = mbconv_pallas(x, kparams, k_size=K_SIZE, stride=STRIDE,
                        use_residual=USE_RESIDUAL)
    out = jax.block_until_ready(out)

    ref = jax.block_until_ready(
        mbconv_reference(x, torch_p, k_size=K_SIZE, stride=STRIDE,
                         use_residual=USE_RESIDUAL))

    assert out.shape == ref.shape == (N, C_OUT, H, W), (out.shape, ref.shape)
    # Tolerance accounts for bf16 boundary/matmul operands (f32 accumulation)
    # vs the all-f32 reference.
    np.testing.assert_allclose(np.asarray(out), np.asarray(ref),
                               rtol=3e-2, atol=3e-2)

    print("KERNEL_OK")
</pallas_src>

<mosaic_0001>
module attributes {stable_mosaic.version = 11 : i64} {
  func.func @mbconv_kernel(%arg0: i32, %arg1: memref<8x512xbf16, #tpu.memory_space<vmem>>, %arg2: memref<32x8xbf16, #tpu.memory_space<vmem>>, %arg3: memref<32x1xf32, #tpu.memory_space<vmem>>, %arg4: memref<32x9xf32, #tpu.memory_space<vmem>>, %arg5: memref<32x1xf32, #tpu.memory_space<vmem>>, %arg6: memref<9x512xf32, #tpu.memory_space<vmem>>, %arg7: memref<2x32xbf16, #tpu.memory_space<vmem>>, %arg8: memref<32x2xbf16, #tpu.memory_space<vmem>>, %arg9: memref<512x2xbf16, #tpu.memory_space<vmem>>, %arg10: memref<2x512xbf16, #tpu.memory_space<vmem>>, %arg11: memref<8x32xbf16, #tpu.memory_space<vmem>>, %arg12: memref<8x1xf32, #tpu.memory_space<vmem>>, %arg13: memref<8x512xf32, #tpu.memory_space<vmem>>) attributes {dimension_semantics = [#tpu.dimension_semantics<parallel>], iteration_bounds = array<i64: 1>, scalar_prefetch = 0 : i64, scratch_operands = 0 : i64, tpu.core_type = #tpu.core_type<tc>, window_params = [{transform_indices = @transform_0, window_bounds = array<i64: 8, 512>}, {pipeline_mode = #tpu.pipeline_mode<synchronous>, transform_indices = @transform_1, window_bounds = array<i64: 32, 8>}, {pipeline_mode = #tpu.pipeline_mode<synchronous>, transform_indices = @transform_2, window_bounds = array<i64: 32, 1>}, {pipeline_mode = #tpu.pipeline_mode<synchronous>, transform_indices = @transform_3, window_bounds = array<i64: 32, 9>}, {pipeline_mode = #tpu.pipeline_mode<synchronous>, transform_indices = @transform_4, window_bounds = array<i64: 32, 1>}, {pipeline_mode = #tpu.pipeline_mode<synchronous>, transform_indices = @transform_5, window_bounds = array<i64: 9, 512>}, {pipeline_mode = #tpu.pipeline_mode<synchronous>, transform_indices = @transform_6, window_bounds = array<i64: 2, 32>}, {pipeline_mode = #tpu.pipeline_mode<synchronous>, transform_indices = @transform_7, window_bounds = array<i64: 32, 2>}, {pipeline_mode = #tpu.pipeline_mode<synchronous>, transform_indices = @transform_8, window_bounds = array<i64: 512, 2>}, {pipeline_mode = #tpu.pipeline_mode<synchronous>, transform_indices = @transform_9, window_bounds = array<i64: 2, 512>}, {pipeline_mode = #tpu.pipeline_mode<synchronous>, transform_indices = @transform_10, window_bounds = array<i64: 8, 32>}, {pipeline_mode = #tpu.pipeline_mode<synchronous>, transform_indices = @transform_11, window_bounds = array<i64: 8, 1>}, {transform_indices = @transform_12, window_bounds = array<i64: 8, 512>}]} {
    %c0 = arith.constant 0 : index
    %c0_0 = arith.constant 0 : index
    %0 = vector.load %arg1[%c0, %c0_0] : memref<8x512xbf16, #tpu.memory_space<vmem>>, vector<8x512xbf16>
    %c0_1 = arith.constant 0 : index
    %c0_2 = arith.constant 0 : index
    %1 = vector.load %arg2[%c0_1, %c0_2] : memref<32x8xbf16, #tpu.memory_space<vmem>>, vector<32x8xbf16>
    %cst = arith.constant dense<0.000000e+00> : vector<32x512xf32>
    %2 = tpu.matmul %1, %0, %cst {dimension_numbers = #tpu.dot_dimension_numbers<[1], [0], [0], [1], [0, 0, 1, 1], [], []>} : vector<32x8xbf16>, vector<8x512xbf16>, vector<32x512xf32> -> vector<32x512xf32>
    %c0_3 = arith.constant 0 : index
    %c0_4 = arith.constant 0 : index
    %3 = vector.load %arg3[%c0_3, %c0_4] : memref<32x1xf32, #tpu.memory_space<vmem>>, vector<32x1xf32>
    %4 = vector.broadcast %3 : vector<32x1xf32> to vector<32x512xf32>
    %5 = arith.addf %2, %4 : vector<32x512xf32>
    %6 = arith.negf %5 : vector<32x512xf32>
    %7 = math.exp %6 : vector<32x512xf32>
    %cst_5 = arith.constant 1.000000e+00 : f32
    %8 = vector.broadcast %cst_5 : f32 to vector<32x512xf32>
    %9 = arith.addf %8, %7 : vector<32x512xf32>
    %10 = arith.divf %8, %9 : vector<32x512xf32>
    %11 = arith.mulf %5, %10 : vector<32x512xf32>
    %c0_6 = arith.constant 0 : index
    %c0_7 = arith.constant 0 : index
    %12 = vector.load %arg4[%c0_6, %c0_7] : memref<32x9xf32, #tpu.memory_space<vmem>>, vector<32x1xf32>
    %c17_i32 = arith.constant 17 : i32
    %13 = tpu.dynamic_rotate %11 by %c17_i32 dim 1 : vector<32x512xf32>, i32 -> vector<32x512xf32>
    %c0_8 = arith.constant 0 : index
    %c0_9 = arith.constant 0 : index
    %14 = vector.load %arg6[%c0_8, %c0_9] : memref<9x512xf32, #tpu.memory_space<vmem>>, vector<1x512xf32>
    %15 = vector.broadcast %14 : vector<1x512xf32> to vector<32x512xf32>
    %16 = arith.mulf %13, %15 : vector<32x512xf32>
    %17 = vector.broadcast %12 : vector<32x1xf32> to vector<32x512xf32>
    %18 = arith.mulf %16, %17 : vector<32x512xf32>
    %c0_10 = arith.constant 0 : index
    %c1 = arith.constant 1 : index
    %19 = vector.load %arg4[%c0_10, %c1] : memref<32x9xf32, #tpu.memory_space<vmem>>, vector<32x1xf32>
    %c16_i32 = arith.constant 16 : i32
    %20 = tpu.dynamic_rotate %11 by %c16_i32 dim 1 : vector<32x512xf32>, i32 -> vector<32x512xf32>
    %c1_11 = arith.constant 1 : index
    %c0_12 = arith.constant 0 : index
    %21 = vector.load %arg6[%c1_11, %c0_12] : memref<9x512xf32, #tpu.memory_space<vmem>>, vector<1x512xf32>
    %22 = vector.broadcast %21 : vector<1x512xf32> to vector<32x512xf32>
    %23 = arith.mulf %20, %22 : vector<32x512xf32>
    %24 = vector.broadcast %19 : vector<32x1xf32> to vector<32x512xf32>
    %25 = arith.mulf %23, %24 : vector<32x512xf32>
    %26 = arith.addf %18, %25 : vector<32x512xf32>
    %c0_13 = arith.constant 0 : index
    %c2 = arith.constant 2 : index
    %27 = vector.load %arg4[%c0_13, %c2] : memref<32x9xf32, #tpu.memory_space<vmem>>, vector<32x1xf32>
    %c15_i32 = arith.constant 15 : i32
    %28 = tpu.dynamic_rotate %11 by %c15_i32 dim 1 : vector<32x512xf32>, i32 -> vector<32x512xf32>
    %c2_14 = arith.constant 2 : index
    %c0_15 = arith.constant 0 : index
    %29 = vector.load %arg6[%c2_14, %c0_15] : memref<9x512xf32, #tpu.memory_space<vmem>>, vector<1x512xf32>
    %30 = vector.broadcast %29 : vector<1x512xf32> to vector<32x512xf32>
    %31 = arith.mulf %28, %30 : vector<32x512xf32>
    %32 = vector.broadcast %27 : vector<32x1xf32> to vector<32x512xf32>
    %33 = arith.mulf %31, %32 : vector<32x512xf32>
    %34 = arith.addf %26, %33 : vector<32x512xf32>
    %c0_16 = arith.constant 0 : index
    %c3 = arith.constant 3 : index
    %35 = vector.load %arg4[%c0_16, %c3] : memref<32x9xf32, #tpu.memory_space<vmem>>, vector<32x1xf32>
    %c1_i32 = arith.constant 1 : i32
    %36 = tpu.dynamic_rotate %11 by %c1_i32 dim 1 : vector<32x512xf32>, i32 -> vector<32x512xf32>
    %c3_17 = arith.constant 3 : index
    %c0_18 = arith.constant 0 : index
    %37 = vector.load %arg6[%c3_17, %c0_18] : memref<9x512xf32, #tpu.memory_space<vmem>>, vector<1x512xf32>
    %38 = vector.broadcast %37 : vector<1x512xf32> to vector<32x512xf32>
    %39 = arith.mulf %36, %38 : vector<32x512xf32>
    %40 = vector.broadcast %35 : vector<32x1xf32> to vector<32x512xf32>
    %41 = arith.mulf %39, %40 : vector<32x512xf32>
    %42 = arith.addf %34, %41 : vector<32x512xf32>
    %c0_19 = arith.constant 0 : index
    %c4 = arith.constant 4 : index
    %43 = vector.load %arg4[%c0_19, %c4] : memref<32x9xf32, #tpu.memory_space<vmem>>, vector<32x1xf32>
    %44 = vector.broadcast %43 : vector<32x1xf32> to vector<32x512xf32>
    %45 = arith.mulf %11, %44 : vector<32x512xf32>
    %46 = arith.addf %42, %45 : vector<32x512xf32>
    %c0_20 = arith.constant 0 : index
    %c5 = arith.constant 5 : index
    %47 = vector.load %arg4[%c0_20, %c5] : memref<32x9xf32, #tpu.memory_space<vmem>>, vector<32x1xf32>
    %c511_i32 = arith.constant 511 : i32
    %48 = tpu.dynamic_rotate %11 by %c511_i32 dim 1 : vector<32x512xf32>, i32 -> vector<32x512xf32>
    %c5_21 = arith.constant 5 : index
    %c0_22 = arith.constant 0 : index
    %49 = vector.load %arg6[%c5_21, %c0_22] : memref<9x512xf32, #tpu.memory_space<vmem>>, vector<1x512xf32>
    %50 = vector.broadcast %49 : vector<1x512xf32> to vector<32x512xf32>
    %51 = arith.mulf %48, %50 : vector<32x512xf32>
    %52 = vector.broadcast %47 : vector<32x1xf32> to vector<32x512xf32>
    %53 = arith.mulf %51, %52 : vector<32x512xf32>
    %54 = arith.addf %46, %53 : vector<32x512xf32>
    %c0_23 = arith.constant 0 : index
    %c6 = arith.constant 6 : index
    %55 = vector.load %arg4[%c0_23, %c6] : memref<32x9xf32, #tpu.memory_space<vmem>>, vector<32x1xf32>
    %c497_i32 = arith.constant 497 : i32
    %56 = tpu.dynamic_rotate %11 by %c497_i32 dim 1 : vector<32x512xf32>, i32 -> vector<32x512xf32>
    %c6_24 = arith.constant 6 : index
    %c0_25 = arith.constant 0 : index
    %57 = vector.load %arg6[%c6_24, %c0_25] : memref<9x512xf32, #tpu.memory_space<vmem>>, vector<1x512xf32>
    %58 = vector.broadcast %57 : vector<1x512xf32> to vector<32x512xf32>
    %59 = arith.mulf %56, %58 : vector<32x512xf32>
    %60 = vector.broadcast %55 : vector<32x1xf32> to vector<32x512xf32>
    %61 = arith.mulf %59, %60 : vector<32x512xf32>
    %62 = arith.addf %54, %61 : vector<32x512xf32>
    %c0_26 = arith.constant 0 : index
    %c7 = arith.constant 7 : index
    %63 = vector.load %arg4[%c0_26, %c7] : memref<32x9xf32, #tpu.memory_space<vmem>>, vector<32x1xf32>
    %c496_i32 = arith.constant 496 : i32
    %64 = tpu.dynamic_rotate %11 by %c496_i32 dim 1 : vector<32x512xf32>, i32 -> vector<32x512xf32>
    %c7_27 = arith.constant 7 : index
    %c0_28 = arith.constant 0 : index
    %65 = vector.load %arg6[%c7_27, %c0_28] : memref<9x512xf32, #tpu.memory_space<vmem>>, vector<1x512xf32>
    %66 = vector.broadcast %65 : vector<1x512xf32> to vector<32x512xf32>
    %67 = arith.mulf %64, %66 : vector<32x512xf32>
    %68 = vector.broadcast %63 : vector<32x1xf32> to vector<32x512xf32>
    %69 = arith.mulf %67, %68 : vector<32x512xf32>
    %70 = arith.addf %62, %69 : vector<32x512xf32>
    %c0_29 = arith.constant 0 : index
    %c8 = arith.constant 8 : index
    %71 = vector.load %arg4[%c0_29, %c8] : memref<32x9xf32, #tpu.memory_space<vmem>>, vector<32x1xf32>
    %c495_i32 = arith.constant 495 : i32
    %72 = tpu.dynamic_rotate %11 by %c495_i32 dim 1 : vector<32x512xf32>, i32 -> vector<32x512xf32>
    %c8_30 = arith.constant 8 : index
    %c0_31 = arith.constant 0 : index
    %73 = vector.load %arg6[%c8_30, %c0_31] : memref<9x512xf32, #tpu.memory_space<vmem>>, vector<1x512xf32>
    %74 = vector.broadcast %73 : vector<1x512xf32> to vector<32x512xf32>
    %75 = arith.mulf %72, %74 : vector<32x512xf32>
    %76 = vector.broadcast %71 : vector<32x1xf32> to vector<32x512xf32>
    %77 = arith.mulf %75, %76 : vector<32x512xf32>
    %78 = arith.addf %70, %77 : vector<32x512xf32>
    %c0_32 = arith.constant 0 : index
    %c0_33 = arith.constant 0 : index
    %79 = vector.load %arg5[%c0_32, %c0_33] : memref<32x1xf32, #tpu.memory_space<vmem>>, vector<32x1xf32>
    %80 = vector.broadcast %79 : vector<32x1xf32> to vector<32x512xf32>
    %81 = arith.addf %78, %80 : vector<32x512xf32>
    %82 = arith.negf %81 : vector<32x512xf32>
    %83 = math.exp %82 : vector<32x512xf32>
    %cst_34 = arith.constant 1.000000e+00 : f32
    %84 = vector.broadcast %cst_34 : f32 to vector<32x512xf32>
    %85 = arith.addf %84, %83 : vector<32x512xf32>
    %86 = arith.divf %84, %85 : vector<32x512xf32>
    %87 = arith.mulf %81, %86 : vector<32x512xf32>
    %88 = arith.truncf %87 : vector<32x512xf32> to vector<32x512xbf16>
    %c0_35 = arith.constant 0 : index
    %c0_36 = arith.constant 0 : index
    %89 = vector.load %arg9[%c0_35, %c0_36] : memref<512x2xbf16, #tpu.memory_space<vmem>>, vector<512x2xbf16>
    %cst_37 = arith.constant dense<0.000000e+00> : vector<32x2xf32>
    %90 = tpu.matmul %88, %89, %cst_37 {dimension_numbers = #tpu.dot_dimension_numbers<[1], [0], [0], [1], [0, 0, 1, 1], [], []>} : vector<32x512xbf16>, vector<512x2xbf16>, vector<32x2xf32> -> vector<32x2xf32>
    %cst_38 = arith.constant 3.906250e-03 : f32
    %91 = vector.broadcast %cst_38 : f32 to vector<32x2xf32>
    %92 = arith.mulf %90, %91 : vector<32x2xf32>
    %c0_39 = arith.constant 0 : index
    %c0_40 = arith.constant 0 : index
    %93 = vector.load %arg7[%c0_39, %c0_40] : memref<2x32xbf16, #tpu.memory_space<vmem>>, vector<2x32xbf16>
    %94 = arith.truncf %92 : vector<32x2xf32> to vector<32x2xbf16>
    %cst_41 = arith.constant dense<0.000000e+00> : vector<2x2xf32>
    %95 = tpu.matmul %93, %94, %cst_41 {dimension_numbers = #tpu.dot_dimension_numbers<[1], [0], [0], [1], [0, 0, 1, 1], [], []>} : vector<2x32xbf16>, vector<32x2xbf16>, vector<2x2xf32> -> vector<2x2xf32>
    %96 = arith.negf %95 : vector<2x2xf32>
    %97 = math.exp %96 : vector<2x2xf32>
    %cst_42 = arith.constant 1.000000e+00 : f32
    %98 = vector.broadcast %cst_42 : f32 to vector<2x2xf32>
    %99 = arith.addf %98, %97 : vector<2x2xf32>
    %100 = arith.divf %98, %99 : vector<2x2xf32>
    %101 = arith.mulf %95, %100 : vector<2x2xf32>
    %c0_43 = arith.constant 0 : index
    %c0_44 = arith.constant 0 : index
    %102 = vector.load %arg8[%c0_43, %c0_44] : memref<32x2xbf16, #tpu.memory_space<vmem>>, vector<32x2xbf16>
    %103 = arith.truncf %101 : vector<2x2xf32> to vector<2x2xbf16>
    %cst_45 = arith.constant dense<0.000000e+00> : vector<32x2xf32>
    %104 = tpu.matmul %102, %103, %cst_45 {dimension_numbers = #tpu.dot_dimension_numbers<[1], [0], [0], [1], [0, 0, 1, 1], [], []>} : vector<32x2xbf16>, vector<2x2xbf16>, vector<32x2xf32> -> vector<32x2xf32>
    %105 = arith.negf %104 : vector<32x2xf32>
    %106 = math.exp %105 : vector<32x2xf32>
    %cst_46 = arith.constant 1.000000e+00 : f32
    %107 = vector.broadcast %cst_46 : f32 to vector<32x2xf32>
    %108 = arith.addf %107, %106 : vector<32x2xf32>
    %109 = arith.divf %107, %108 : vector<32x2xf32>
    %110 = arith.truncf %109 : vector<32x2xf32> to vector<32x2xbf16>
    %c0_47 = arith.constant 0 : index
    %c0_48 = arith.constant 0 : index
    %111 = vector.load %arg10[%c0_47, %c0_48] : memref<2x512xbf16, #tpu.memory_space<vmem>>, vector<2x512xbf16>
    %cst_49 = arith.constant dense<0.000000e+00> : vector<32x512xf32>
    %112 = tpu.matmul %110, %111, %cst_49 {dimension_numbers = #tpu.dot_dimension_numbers<[1], [0], [0], [1], [0, 0, 1, 1], [], []>} : vector<32x2xbf16>, vector<2x512xbf16>, vector<32x512xf32> -> vector<32x512xf32>
    %113 = arith.mulf %87, %112 : vector<32x512xf32>
    %114 = arith.truncf %113 : vector<32x512xf32> to vector<32x512xbf16>
    %c0_50 = arith.constant 0 : index
    %c0_51 = arith.constant 0 : index
    %115 = vector.load %arg11[%c0_50, %c0_51] : memref<8x32xbf16, #tpu.memory_space<vmem>>, vector<8x32xbf16>
    %cst_52 = arith.constant dense<0.000000e+00> : vector<8x512xf32>
    %116 = tpu.matmul %115, %114, %cst_52 {dimension_numbers = #tpu.dot_dimension_numbers<[1], [0], [0], [1], [0, 0, 1, 1], [], []>} : vector<8x32xbf16>, vector<32x512xbf16>, vector<8x512xf32> -> vector<8x512xf32>
    %c0_53 = arith.constant 0 : index
    %c0_54 = arith.constant 0 : index
    %117 = vector.load %arg12[%c0_53, %c0_54] : memref<8x1xf32, #tpu.memory_space<vmem>>, vector<8x1xf32>
    %118 = vector.broadcast %117 : vector<8x1xf32> to vector<8x512xf32>
    %119 = arith.addf %116, %118 : vector<8x512xf32>
    %120 = arith.extf %0 : vector<8x512xbf16> to vector<8x512xf32>
    %121 = arith.addf %119, %120 : vector<8x512xf32>
    %c0_55 = arith.constant 0 : index
    %c0_56 = arith.constant 0 : index
    %122 = vector.load %arg13[%c0_55, %c0_56] : memref<8x512xf32, #tpu.memory_space<vmem>>, vector<8x512xf32>
    tpu.vector_store %arg13[%c0_55, %c0_56], %121 {strides = array<i32>} : memref<8x512xf32, #tpu.memory_space<vmem>>, vector<8x512xf32>,
    return
  }
  func.func @transform_0(%arg0: i32) -> (i32, i32) {
    %c0_i32 = arith.constant 0 : i32
    %c0_i32_0 = arith.constant 0 : i32
    return %c0_i32, %arg0 : i32, i32
  }
  func.func @transform_1(%arg0: i32) -> (i32, i32) {
    %c0_i32 = arith.constant 0 : i32
    %c0_i32_0 = arith.constant 0 : i32
    %c0_i32_1 = arith.constant 0 : i32
    return %c0_i32, %c0_i32_0 : i32, i32
  }
  func.func @transform_2(%arg0: i32) -> (i32, i32) {
    %c0_i32 = arith.constant 0 : i32
    %c0_i32_0 = arith.constant 0 : i32
    %c0_i32_1 = arith.constant 0 : i32
    return %c0_i32, %c0_i32_0 : i32, i32
  }
  func.func @transform_3(%arg0: i32) -> (i32, i32) {
    %c0_i32 = arith.constant 0 : i32
    %c0_i32_0 = arith.constant 0 : i32
    %c0_i32_1 = arith.constant 0 : i32
    return %c0_i32, %c0_i32_0 : i32, i32
  }
  func.func @transform_4(%arg0: i32) -> (i32, i32) {
    %c0_i32 = arith.constant 0 : i32
    %c0_i32_0 = arith.constant 0 : i32
    %c0_i32_1 = arith.constant 0 : i32
    return %c0_i32, %c0_i32_0 : i32, i32
  }
  func.func @transform_5(%arg0: i32) -> (i32, i32) {
    %c0_i32 = arith.constant 0 : i32
    %c0_i32_0 = arith.constant 0 : i32
    %c0_i32_1 = arith.constant 0 : i32
    return %c0_i32, %c0_i32_0 : i32, i32
  }
  func.func @transform_6(%arg0: i32) -> (i32, i32) {
    %c0_i32 = arith.constant 0 : i32
    %c0_i32_0 = arith.constant 0 : i32
    %c0_i32_1 = arith.constant 0 : i32
    return %c0_i32, %c0_i32_0 : i32, i32
  }
  func.func @transform_7(%arg0: i32) -> (i32, i32) {
    %c0_i32 = arith.constant 0 : i32
    %c0_i32_0 = arith.constant 0 : i32
    %c0_i32_1 = arith.constant 0 : i32
    return %c0_i32, %c0_i32_0 : i32, i32
  }
  func.func @transform_8(%arg0: i32) -> (i32, i32) {
    %c0_i32 = arith.constant 0 : i32
    %c0_i32_0 = arith.constant 0 : i32
    %c0_i32_1 = arith.constant 0 : i32
    return %c0_i32, %c0_i32_0 : i32, i32
  }
  func.func @transform_9(%arg0: i32) -> (i32, i32) {
    %c0_i32 = arith.constant 0 : i32
    %c0_i32_0 = arith.constant 0 : i32
    %c0_i32_1 = arith.constant 0 : i32
    return %c0_i32, %c0_i32_0 : i32, i32
  }
  func.func @transform_10(%arg0: i32) -> (i32, i32) {
    %c0_i32 = arith.constant 0 : i32
    %c0_i32_0 = arith.constant 0 : i32
    %c0_i32_1 = arith.constant 0 : i32
    return %c0_i32, %c0_i32_0 : i32, i32
  }
  func.func @transform_11(%arg0: i32) -> (i32, i32) {
    %c0_i32 = arith.constant 0 : i32
    %c0_i32_0 = arith.constant 0 : i32
    %c0_i32_1 = arith.constant 0 : i32
    return %c0_i32, %c0_i32_0 : i32, i32
  }
  func.func @transform_12(%arg0: i32) -> (i32, i32) {
    %c0_i32 = arith.constant 0 : i32
    %c0_i32_0 = arith.constant 0 : i32
    return %c0_i32, %arg0 : i32, i32
  }
}

</mosaic_0001>

<bundles_post_ra>
// kernel: tpu_custom_call.1
= control target key start
LH: loop header
LB: loop body
LE: loop exit
PB: predicated region body
PF: predicated region fallthrough
CT: control target
= control target key end

     0   :  { %vm100_vm0 = vcmask 1043456   ;;  %v4888_v6 = vmov 0   ;;  %vm93_vm1 = vcmask 64512   ;;  %v2871_v17 = vmov 1   ;;  %s4875_s0 = inlined_call_operand.vmem [shape: bf16[8,512], index: 0, kind: input, shape index: {}]   ;;  %s4876_s1 = inlined_call_operand.vmem [shape: bf16[32,8], index: 1, kind: input, shape index: {}]   ;;  %s4877_s2 = inlined_call_operand.vmem [shape: f32[32,1], index: 2, kind: input, shape index: {}]   ;;  %s4878_s3 = inlined_call_operand.vmem [shape: f32[32,9], index: 3, kind: input, shape index: {}]   ;;  %s4879_s4 = inlined_call_operand.vmem [shape: f32[32,1], index: 4, kind: input, shape index: {}]   ;;  %s4880_s5 = inlined_call_operand.vmem [shape: f32[9,512], index: 5, kind: input, shape index: {}]   ;;  %s4881_s6 = inlined_call_operand.vmem [shape: bf16[2,32], index: 6, kind: input, shape index: {}]   ;;  %s4882_s7 = inlined_call_operand.vmem [shape: bf16[32,2], index: 7, kind: input, shape index: {}]   ;;  %s4883_s8 = inlined_call_operand.vmem [shape: bf16[512,2], index: 8, kind: input, shape index: {}]   ;;  %s4884_s9 = inlined_call_operand.vmem [shape: bf16[2,512], index: 9, kind: input, shape index: {}]   ;;  %s4885_s10 = inlined_call_operand.vmem [shape: bf16[8,32], index: 10, kind: input, shape index: {}]   ;;  %s4886_s11 = inlined_call_operand.vmem [shape: f32[8,1], index: 11, kind: input, shape index: {}]   ;;  %s4887_s12 = inlined_call_operand.hbm [shape: f32[8,512], index: 12, kind: output, shape index: {}]  }
   0x1   :  { %v43_v0 = vld [vmem:[%s4875_s0] sm:$0xff]  ;;  %v44_v1 = vld [vmem:[%s4875_s0 + $0x8] sm:$0xff]  ;;  %145 = vmatprep.mubr.bf16.mxu0 %v4888_v6  ;;  %198 = vmatprep.mubr.bf16.mxu1 %v4888_v6  ;;  %v51_v11 = vld [vmem:[%s4877_s2 + $0x10] sm:$0xff]  ;;  %v2872_v19 = vmov 2   ;;  %v4895_v20 = vmov 5   ;;  %v2874_v21 = vmov 3  }
   0x2   :  { %v2428_v2 = vcombine.high %v43_v0, %v43_v0  ;;  %v2430_v3 = vcombine.high %v44_v1, %v44_v1  ;;  %v2427_v4 = vcombine.low %v43_v0, %v43_v0  ;;  %v2429_v5 = vcombine.low %v44_v1, %v44_v1  ;;  %2625 = vset.pattern.permute.xlu0 %v4888_v6  ;;  %v49_v7 = vld [vmem:[%s4877_s2] sm:$0xff]  ;;  %v50_v12 = vld [vmem:[%s4877_s2 + $0x8] sm:$0xff]  ;;  %v52_v13 = vld [vmem:[%s4877_s2 + $0x18] sm:$0xff] }
   0x3   :  { %v2659_v10 = vld [vmem:[%s4876_s1] sm:$0xff]   ;;  %55 = vperm.xlu0 %2625, %v49_v7   ;;  %2626 = vset.pattern.permute.xlu1 %v4888_v6  ;;  %v2660_v15 = vld [vmem:[%s4876_s1 + $0x8] sm:$0xff]   ;;  %v3005_v18 = vld [vmem:[%s4878_s3 + $0x10] sm:$0xff] }
   0x4   :  { %2431 = vmatprep.subr.msk.bf16.mxu0 %vm100_vm0, %v2428_v2  ;;  %2434 = vmatprep.subr.msk.bf16.mxu1 %vm100_vm0, %v2430_v3  ;;  %v102_v8 = vsel %vm100_vm0, %v2427_v4, 0  ;;  %v108_v9 = vsel %vm100_vm0, %v2429_v5, 0  ;;  %v2988_v14 = vld [vmem:[%s4878_s3] sm:$0xff]  ;;  %v2996_v16 = vld [vmem:[%s4878_s3 + $0x8] sm:$0xff] }
   0x5   :  { %128 = vmatpush1.bf16.msra.mxu0 %v102_v8  ;;  %181 = vmatpush1.bf16.msra.mxu1 %v108_v9 }
   0x6   :  { %65 = vperm.xlu1 %2626, %v51_v11  }
   0x7   :  { %60 = vperm.xlu0 %2625, %v50_v12  }
   0x8   :  { %2432 = vmatmul.mubr.msk.bf16.vlgmr.msra.gmra.mxu0 %vm93_vm1, %v2659_v10  ;;  %2435 = vmatmul.mubr.msk.bf16.vlgmr.msra.gmra.mxu1 %vm93_vm1, %v2659_v10 }
   0x9   :  { %155 = vmatprep.mubr.bf16.mxu0 %v4888_v6  ;;  %208 = vmatprep.mubr.bf16.mxu1 %v4888_v6 }
   0xa   :  { %70 = vperm.xlu1 %2626, %v52_v13  }
   0xb   :  { %426 = vperm.xlu0 %2625, %v2988_v14  }
   0xe   :  { %431 = vperm.xlu1 %2626, %v2996_v16  }
   0xf   :  { %2627 = vset.pattern.permute.xlu0 %v2871_v17 }
  0x10   :  { %2433 = vmatmul.mubr.msk.bf16.gmra.mxu0 %vm93_vm1, %v2660_v15  ;;  %2436 = vmatmul.mubr.msk.bf16.gmra.mxu1 %vm93_vm1, %v2660_v15 }
  0x11   :  { %549 = vperm.xlu0 %2627, %v2988_v14  }
  0x12   :  { %2628 = vset.pattern.permute.xlu1 %v2871_v17 }
  0x13   :  { %553 = vperm.xlu1 %2628, %v2996_v16  }
  0x15   :  { %557 = vperm.xlu0 %2627, %v3005_v18  }
  0x17   :  { %2629 = vset.pattern.permute.xlu1 %v2872_v19 }
  0x18   :  { %685 = vperm.xlu1 %2629, %v2988_v14  }
  0x19   :  { %2635 = vset.pattern.permute.xlu0 %v4895_v20 }
  0x1a   :  { %1009 = vperm.xlu0 %2635, %v2996_v16  }
  0x1c   :  { %2630 = vset.pattern.permute.xlu1 %v2874_v21 }
  0x1d   :  { %17 = vsyncpa [#allocation3], 0  ;;  %825 = vperm.xlu1 %2630, %v2996_v16   ;;  %v2875_v22 = vmov 4   ;;  %v3022_v23 = vld [vmem:[%s4878_s3 + $0x18] sm:$0xff]  ;;  %v4892_v24 = vmov 6   ;;  %v4893_v25 = vmov 7  }
  0x1e   :  { %2636 = vset.pattern.permute.xlu0 %v2872_v19  ;;  %s2878_s25 = smov 17   ;;  %s2879_s26 = smov 15   ;;  %vm2888_vm10 = vmmov 0   ;;  %vm1981_vm11 = vcmask 261120   ;;  %vm2047_vm12 = vcmask 15360   ;;  %vm2054_vm13 = vcmask 1040384  }
  0x1f   :  { %689 = vperm.xlu0 %2636, %v2996_v16   ;;  %s2880_s27 = smov 16   ;;  %s2881_s28 = smov 1  }
  0x20   :  { %s2882_s29 = smov 127   ;;  %s2883_s30 = smov 113  }
  0x21   :  { %2631 = vset.pattern.permute.xlu1 %v2875_v22  ;;  %s2884_s13 = smov 112   ;;  %s2886_s14 = smov 111  }
  0x22   :  { %869 = vperm.xlu1 %2631, %v2988_v14  }
  0x23   :  { %693 = vperm.xlu0 %2636, %v3005_v18  }
  0x26   :  { %2632 = vset.pattern.permute.xlu1 %v4888_v6 }
  0x27   :  { %436 = vperm.xlu1 %2632, %v3005_v18   ;;  %2637 = vset.pattern.permute.xlu0 %v2874_v21 }
  0x28   :  { %821 = vperm.xlu0 %2637, %v2988_v14  }
  0x2b   :  { %441 = vperm.xlu1 %2632, %v3022_v23  }
  0x2c   :  { %829 = vperm.xlu0 %2637, %v3005_v18  }
  0x2f   :  { %2633 = vset.pattern.permute.xlu1 %v2871_v17 }
  0x30   :  { %561 = vperm.xlu1 %2633, %v3022_v23   ;;  %2640 = vset.pattern.permute.xlu0 %v2875_v22 }
  0x31   :  { %873 = vperm.xlu0 %2640, %v2996_v16  }
  0x34   :  { %2634 = vset.pattern.permute.xlu1 %v4895_v20 }
  0x35   :  { %1005 = vperm.xlu1 %2634, %v2988_v14   ;;  %877 = vperm.xlu0 %2640, %v3005_v18  }
  0x39   :  { %2638 = vset.pattern.permute.xlu1 %v2872_v19  ;;  %2643 = vset.pattern.permute.xlu0 %v4892_v24 }
  0x3a   :  { %697 = vperm.xlu1 %2638, %v3022_v23   ;;  %1145 = vperm.xlu0 %2643, %v2996_v16  }
  0x3e   :  { %2639 = vset.pattern.permute.xlu1 %v4892_v24 }
  0x3f   :  { %1141 = vperm.xlu1 %2639, %v2988_v14  }
  0x43   :  { %2641 = vset.pattern.permute.xlu1 %v2874_v21 }
  0x44   :  { %833 = vperm.xlu1 %2641, %v3022_v23  }
  0x48   :  { %2642 = vset.pattern.permute.xlu1 %v4893_v25 }
  0x49   :  { %1277 = vperm.xlu1 %2642, %v2988_v14  }
  0x4d   :  { %2644 = vset.pattern.permute.xlu1 %v2875_v22 }
  0x4e   :  { %881 = vperm.xlu1 %2644, %v3022_v23  }
  0x7e   :  { %v56_v26 = vpop.permute.xlu0 %55 }
  0x81   :  { %v3077_v12 = vpop.permute.xlu1 %65 }
  0x82   :  { %v61_v37 = vpop.permute.xlu0 %60 }
  0x85   :  { %v3083_v15 = vpop.permute.xlu1 %70 }
  0x89   :  { %v3093_v17 = vpop.permute.xlu1 %431 }
  0xc8   :  { %v147_v27 = vpop.f32.mrf.mxu0  ;;  %v200_v28 = vpop.f32.mrf.mxu1 }
  0xc9   :  { %v148_v29 = vadd.f32 %v147_v27, %v56_v26  ;;  %v201_v30 = vadd.f32 %v200_v28, %v56_v26 }
  0xca   :  { %v149_v31 = vpop.f32.mrf.mxu0  ;;  %v202_v32 = vpop.f32.mrf.mxu1 }
  0xcb   :  { %v2437_v33 = vmul.f32 -1.442695, %v148_v29  ;;  %v2439_v34 = vmul.f32 -1.442695, %v201_v30  ;;  %v150_v35 = vadd.f32 %v149_v31, %v56_v26  ;;  %v203_v36 = vadd.f32 %v202_v32, %v56_v26  ;;  %v3099_v26 = vpop.permute.xlu1 %553 }
  0xcc   :  { %v151_v38 = vpop.f32.mrf.mxu0  ;;  %v204_v42 = vpop.f32.mrf.mxu1 }
  0xcd   :  { %2695 = vpow2.f32 %v2437_v33  ;;  %v2438_v39 = vmul.f32 -1.442695, %v150_v35  ;;  %v2440_v40 = vmul.f32 -1.442695, %v203_v36  ;;  %v152_v41 = vadd.f32 %v151_v38, %v61_v37 }
  0xce   :  { %2697 = vpow2.f32 %v2439_v34  ;;  %v205_v44 = vadd.f32 %v204_v42, %v61_v37  ;;  %v153_v5 = vpop.f32.mrf.mxu0  ;;  %v206_v9 = vpop.f32.mrf.mxu1 }
  0xcf   :  { %2699 = vpow2.f32 %v2438_v39  ;;  %v2441_v43 = vmul.f32 -1.442695, %v152_v41  ;;  %v154_v8 = vadd.f32 %v153_v5, %v61_v37  ;;  %v207_v11 = vadd.f32 %v206_v9, %v61_v37  ;;  %v3109_v28 = vpop.permute.xlu1 %685 }
  0xd0   :  { %2701 = vpow2.f32 %v2440_v40  ;;  %v2443_v45 = vmul.f32 -1.442695, %v205_v44  ;;  %5003 = vst [vmem:[#allocation9_spill] sm:$0xff] %v3109_v28  ;;  %v210_v34 = vpop.f32.mrf.mxu1  ;;  %v157_v38 = vpop.f32.mrf.mxu0 }
  0xd1   :  { %2703 = vpow2.f32 %v2441_v43  ;;  %v2442_v10 = vmul.f32 -1.442695, %v154_v8  ;;  %v2444_v13 = vmul.f32 -1.442695, %v207_v11 }
  0xd2   :  { %2705 = vpow2.f32 %v2443_v45 }
  0xda   :  { %v2696_v46 = vpop.eup %2695 }
  0xdb   :  { %v2698_v47 = vpop.eup %2697  ;;  %v267_v48 = vadd.f32 1.0, %v2696_v46 }
  0xdc   :  { %v2700_v49 = vpop.eup %2699  ;;  %v269_v50 = vadd.f32 1.0, %v2698_v47 }
  0xdd   :  { %v2702_v51 = vpop.eup %2701  ;;  %2707 = vrcp.f32 %v267_v48  ;;  %v268_v52 = vadd.f32 1.0, %v2700_v49  ;;  %v159_v48 = vpop.f32.mrf.mxu0 }
  0xde   :  { %2709 = vrcp.f32 %v269_v50  ;;  %v270_v53 = vadd.f32 1.0, %v2702_v51  ;;  %v2704_v54 = vpop.eup %2703  ;;  %v3175_v51 = vadd.f32 %v159_v48, %v3077_v12 }
  0xdf   :  { %2711 = vrcp.f32 %v268_v52  ;;  %v271_v55 = vadd.f32 1.0, %v2704_v54  ;;  %v2706_v56 = vpop.eup %2705  ;;  %v212_v52 = vpop.f32.mrf.mxu1 }
  0xe0   :  { %2713 = vrcp.f32 %v270_v53  ;;  %v273_v57 = vadd.f32 1.0, %v2706_v56  ;;  %v161_v53 = vpop.f32.mrf.mxu0 }
  0xe1   :  { %2715 = vrcp.f32 %v271_v55  ;;  %v3180_v54 = vadd.f32 %v161_v53, %v3083_v15 }
  0xe2   :  { %2717 = vrcp.f32 %v273_v57  ;;  %v2446_v57 = vmul.f32 -1.442695, %v3175_v51 }
  0xe3   :  { %2719 = vpow2.f32 %v2442_v10 }
  0xe4   :  { %2721 = vpow2.f32 %v2444_v13 }
  0xea   :  { %v2708_v58 = vpop.eup %2707 }
  0xeb   :  { %v2710_v59 = vpop.eup %2709  ;;  %v3041_v60 = vmul.f32 %v2708_v58, %v148_v29  ;;  %v3115_v29 = vpop.permute.xlu1 %825  ;;  %v3188_v58 = vadd.f32 %v212_v52, %v3077_v12 }
  0xec   :  { %v3043_v61 = vmul.f32 %v2710_v59, %v201_v30  ;;  %v2712_v62 = vpop.eup %2711  ;;  %v3119_v30 = vpop.permute.xlu0 %426 }
  0xed   :  { %4999 = vst [vmem:[#allocation5_spill] sm:$0xff] %v3041_v60  ;;  %335 = vrot.lane.b32.xlu1 %v3041_v60, %s2878_s25  ;;  %v3049_v63 = vmul.f32 %v2712_v62, %v150_v35  ;;  %v2714_v0 = vpop.eup %2713  ;;  %5004 = vst [vmem:[#allocation10_spill] sm:$0xff] %v3119_v30  ;;  %v214_v59 = vpop.f32.mrf.mxu1  ;;  %v2449_v62 = vmul.f32 -1.442695, %v3180_v54  ;;  %v367_v30 = vlaneseq }
  0xee   :  { %5000 = vst [vmem:[#allocation6_spill] sm:$0xff] %v3043_v61  ;;  %612 = vrot.lane.b32.xlu0 %v3043_v61, %s2879_s26  ;;  %v3055_v1 = vmul.f32 %v2714_v0, %v203_v36  ;;  %v2716_v2 = vpop.eup %2715  ;;  %v3134_v36 = vadd.f32 %v210_v34, %v3077_v12  ;;  %v3194_v0 = vadd.f32 %v214_v59, %v3083_v15 }
  0xef   :  { %5001 = vst [vmem:[#allocation7_spill] sm:$0xff] %v3049_v63  ;;  %v3061_v3 = vmul.f32 %v2716_v2, %v152_v41  ;;  %v2718_v4 = vpop.eup %2717  ;;  %v3129_v33 = vpop.permute.xlu1 %869  ;;  %v3145_v41 = vadd.f32 %v157_v38, %v3077_v12 }
  0xf0   :  { %5002 = vst [vmem:[#allocation8_spill] sm:$0xff] %v3055_v1  ;;  %v3067_v7 = vmul.f32 %v2718_v4, %v205_v44  ;;  %v2720_v19 = vpop.eup %2719  ;;  %v3125_v32 = vpop.permute.xlu0 %549  ;;  %5006 = vst [vmem:[#allocation12_spill] sm:$0xff] %v3129_v33  ;;  %v2447_v42 = vmul.f32 -1.442695, %v3134_v36  ;;  %v4890_v44 = vmov 8  }
  0xf1   :  { %351 = vrot.lane.b32.xlu1 %v3043_v61, %s2878_s25  ;;  %v272_v21 = vadd.f32 1.0, %v2720_v19  ;;  %v2722_v22 = vpop.eup %2721  ;;  %5005 = vst [vmem:[#allocation11_spill] sm:$0xff] %v3125_v32  ;;  %v2445_v45 = vmul.f32 -1.442695, %v3145_v41  ;;  %v2451_v9 = vmul.f32 -1.442695, %v3194_v0 }
  0xf2   :  { %604 = vrot.lane.b32.xlu0 %v3049_v63, %s2879_s26  ;;  %v274_v27 = vadd.f32 1.0, %v2722_v22  ;;  %2645 = vset.pattern.permute.xlu1 %v4890_v44 }
  0xf3   :  { %2723 = vrcp.f32 %v272_v21  ;;  %v3140_v39 = vpop.permute.xlu1 %436 }
  0xf4   :  { %2725 = vrcp.f32 %v274_v27  ;;  %5007 = vst [vmem:[#allocation13_spill] sm:$0xff] %v3140_v39  ;;  %v3148_v43 = vpop.permute.xlu0 %557 }
  0xf5   :  { %460 = vrot.lane.b32.xlu1 %v3041_v60, %s2880_s27  ;;  %5008 = vst [vmem:[#allocation14_spill] sm:$0xff] %v3148_v43  ;;  %2727 = vpow2.f32 %v2447_v42 }
  0xf6   :  { %620 = vrot.lane.b32.xlu0 %v3055_v1, %s2879_s26  ;;  %2729 = vpow2.f32 %v2445_v45 }
  0xf7   :  { %v3156_v46 = vpop.permute.xlu1 %441  ;;  %2731 = vpow2.f32 %v2446_v57 }
  0xf8   :  { %5009 = vst [vmem:[#allocation15_spill] sm:$0xff] %v3156_v46  ;;  %v3162_v47 = vpop.permute.xlu0 %1009  ;;  %2733 = vpow2.f32 %v2449_v62  ;;  %v163_v62 = vpop.f32.mrf.mxu0 }
  0xf9   :  { %476 = vrot.lane.b32.xlu1 %v3043_v61, %s2880_s27 }
  0xfa   :  { %337 = vrot.lane.b32.xlu0 %v3061_v3, %s2878_s25 }
  0xfb   :  { %v3168_v49 = vpop.permute.xlu1 %561 }
  0xfc   :  { %5010 = vst [vmem:[#allocation16_spill] sm:$0xff] %v3168_v49  ;;  %v3170_v50 = vpop.permute.xlu0 %689  ;;  %v5059_v49 = vmov 5  }
  0xfd   :  { %596 = vrot.lane.b32.xlu1 %v3041_v60, %s2879_s26 }
  0xfe   :  { %353 = vrot.lane.b32.xlu0 %v3067_v7, %s2878_s25 }
  0xff   :  { %v3182_v56 = vpop.permute.xlu1 %1005 }
 0x100   :  { %v2724_v31 = vpop.eup %2723  ;;  %5011 = vst [vmem:[#allocation17_spill] sm:$0xff] %v3182_v56  ;;  %v3196_v2 = vpop.permute.xlu0 %693 }
 0x101   :  { %732 = vrot.lane.b32.xlu1 %v3041_v60, %s2881_s28  ;;  %v3131_v35 = vmul.f32 %v2724_v31, %v154_v8  ;;  %v2726_v37 = vpop.eup %2725  ;;  %5012 = vst [vmem:[#allocation18_spill] sm:$0xff] %v3196_v2  ;;  %v2448_v8 = vmul.f32 -1.442695, %v3188_v58 }
 0x102   :  { %462 = vrot.lane.b32.xlu0 %v3061_v3, %s2880_s27  ;;  %v3142_v40 = vmul.f32 %v2726_v37, %v207_v11  ;;  %v2728_v55 = vpop.eup %2727 }
 0x103   :  { %v277_v4 = vadd.f32 1.0, %v2728_v55  ;;  %v2730_v5 = vpop.eup %2729  ;;  %v3204_v10 = vpop.permute.xlu1 %697 }
 0x104   :  { %5013 = vst [vmem:[#allocation19_spill] sm:$0xff] %v3204_v10  ;;  %v275_v11 = vadd.f32 1.0, %v2730_v5  ;;  %v3208_v12 = vpop.permute.xlu0 %821  ;;  %v2732_v21 = vpop.eup %2731  ;;  %v3253_v5 = vadd.f32 %v163_v62, %v3083_v15 }
 0x105   :  { %748 = vrot.lane.b32.xlu1 %v3043_v61, %s2881_s28  ;;  %2735 = vrcp.f32 %v277_v4  ;;  %5014 = vst [vmem:[#allocation20_spill] sm:$0xff] %v3208_v12  ;;  %v2734_v27 = vpop.eup %2733  ;;  %v276_v48 = vadd.f32 1.0, %v2732_v21 }
 0x106   :  { %478 = vrot.lane.b32.xlu0 %v3067_v7, %s2880_s27  ;;  %2737 = vpow2.f32 %v2448_v8  ;;  %v279_v38 = vadd.f32 1.0, %v2734_v27 }
 0x107   :  { %2739 = vpow2.f32 %v2451_v9  ;;  %v3212_v13 = vpop.permute.xlu1 %1141  ;;  %v2450_v9 = vmul.f32 -1.442695, %v3253_v5 }
 0x108   :  { %2741 = vrcp.f32 %v275_v11  ;;  %5015 = vst [vmem:[#allocation21_spill] sm:$0xff] %v3212_v13  ;;  %v3218_v19 = vpop.permute.xlu0 %829 }
 0x109   :  { %916 = vrot.lane.b32.xlu1 %v3041_v60, %s2882_s29  ;;  %5016 = vst [vmem:[#allocation22_spill] sm:$0xff] %v3218_v19  ;;  %2743 = vrcp.f32 %v279_v38  ;;  %v5068_v19 = vmov 6  }
 0x10a   :  { %734 = vrot.lane.b32.xlu0 %v3061_v3, %s2881_s28  ;;  %2745 = vrcp.f32 %v276_v48 }
 0x10b   :  { %v3224_v22 = vpop.permute.xlu1 %833 }
 0x10c   :  { %5017 = vst [vmem:[#allocation23_spill] sm:$0xff] %v3224_v22  ;;  %v3228_v34 = vpop.permute.xlu0 %873 }
 0x10d   :  { %932 = vrot.lane.b32.xlu1 %v3043_v61, %s2882_s29 }
 0x10e   :  { %750 = vrot.lane.b32.xlu0 %v3067_v7, %s2881_s28 }
 0x10f   :  { %v3235_v53 = vpop.permute.xlu1 %1277 }
 0x110   :  { %5019 = vst [vmem:[#allocation25_spill] sm:$0xff] %v3235_v53  ;;  %v3239_v55 = vpop.permute.xlu0 %877 }
 0x111   :  { %1052 = vrot.lane.b32.xlu1 %v3041_v60, %s2883_s30  ;;  %5020 = vst [vmem:[#allocation26_spill] sm:$0xff] %v3239_v55 }
 0x112   :  { %918 = vrot.lane.b32.xlu0 %v3061_v3, %s2882_s29  ;;  %v2736_v31 = vpop.eup %2735 }
 0x113   :  { %v2738_v37 = vpop.eup %2737  ;;  %v3233_v45 = vmul.f32 %v2736_v31, %v3134_v36  ;;  %v3255_v8 = vpop.permute.xlu1 %881 }
 0x114   :  { %v2740_v42 = vpop.eup %2739  ;;  %v278_v36 = vadd.f32 1.0, %v2738_v37  ;;  %v3250_v4 = vpop.permute.xlu0 %1145  ;;  %5022 = vst [vmem:[#allocation28_spill] sm:$0xff] %v3255_v8 }
 0x115   :  { %1068 = vrot.lane.b32.xlu1 %v3043_v61, %s2883_s30  ;;  %5018 = vst [vmem:[#allocation24_spill] sm:$0xff] %v3233_v45  ;;  %v2742_v52 = vpop.eup %2741  ;;  %v281_v57 = vadd.f32 1.0, %v2740_v42 }
 0x116   :  { %934 = vrot.lane.b32.xlu0 %v3067_v7, %s2882_s29  ;;  %v3244_v59 = vmul.f32 %v2742_v52, %v3145_v41  ;;  %v216_v41 = vpop.f32.mrf.mxu1  ;;  %v2744_v38 = vpop.eup %2743 }
 0x117   :  { %2747 = vrcp.f32 %v281_v57  ;;  %v3263_v11 = vadd.f32 %v216_v41, %v3083_v15  ;;  %v2746_v15 = vpop.eup %2745  ;;  %v3283_v48 = vmul.f32 %v2744_v38, %v3180_v54 }
 0x118   :  { %5021 = vst [vmem:[#allocation27_spill] sm:$0xff] %v3244_v59  ;;  %2749 = vrcp.f32 %v278_v36  ;;  %v3288_v36 = vmul.f32 %v2746_v15, %v3175_v51 }
 0x119   :  { %1188 = vrot.lane.b32.xlu1 %v3041_v60, %s2884_s13  ;;  %2751 = vpow2.f32 %v2450_v9  ;;  %v2452_v31 = vmul.f32 -1.442695, %v3263_v11 }
 0x11a   :  { %1054 = vrot.lane.b32.xlu0 %v3061_v3, %s2883_s30  ;;  %5028 = vst [vmem:[#allocation34_spill] sm:$0xff] %v3288_v36 }
 0x11b   :  { %2753 = vpow2.f32 %v2452_v31 }
 0x11d   :  { %1204 = vrot.lane.b32.xlu1 %v3043_v61, %s2884_s13 }
 0x11e   :  { %1070 = vrot.lane.b32.xlu0 %v3067_v7, %s2883_s30 }
 0x121   :  { %343 = vrot.lane.b32.xlu1 %v3049_v63, %s2878_s25 }
 0x122   :  { %1190 = vrot.lane.b32.xlu0 %v3061_v3, %s2884_s13 }
 0x124   :  { %v2748_v57 = vpop.eup %2747 }
 0x125   :  { %359 = vrot.lane.b32.xlu1 %v3055_v1, %s2878_s25  ;;  %v2750_v41 = vpop.eup %2749  ;;  %v3297_v9 = vmul.f32 %v2748_v57, %v3194_v0 }
 0x126   :  { %1206 = vrot.lane.b32.xlu0 %v3067_v7, %s2884_s13  ;;  %v3302_v31 = vmul.f32 %v2750_v41, %v3188_v58  ;;  %v2752_v15 = vpop.eup %2751 }
 0x127   :  { %v280_v58 = vadd.f32 1.0, %v2752_v15 }
 0x128   :  { %5031 = vst [vmem:[#allocation37_spill] sm:$0xff] %v3302_v31  ;;  %v2754_v57 = vpop.eup %2753 }
 0x129   :  { %468 = vrot.lane.b32.xlu1 %v3049_v63, %s2880_s27  ;;  %2755 = vrcp.f32 %v280_v58  ;;  %v282_v44 = vadd.f32 1.0, %v2754_v57 }
 0x12a   :  { %345 = vrot.lane.b32.xlu0 %v3131_v35, %s2878_s25 }
 0x12b   :  { %2757 = vrcp.f32 %v282_v44 }
 0x12d   :  { %484 = vrot.lane.b32.xlu1 %v3055_v1, %s2880_s27 }
 0x12e   :  { %361 = vrot.lane.b32.xlu0 %v3142_v40, %s2878_s25 }
 0x131   :  { %740 = vrot.lane.b32.xlu1 %v3049_v63, %s2881_s28 }
 0x132   :  { %470 = vrot.lane.b32.xlu0 %v3131_v35, %s2880_s27 }
 0x135   :  { %756 = vrot.lane.b32.xlu1 %v3055_v1, %s2881_s28 }
 0x136   :  { %486 = vrot.lane.b32.xlu0 %v3142_v40, %s2880_s27  ;;  %v2756_v53 = vpop.eup %2755 }
 0x137   :  { %v3359_v56 = vmul.f32 %v2756_v53, %v3253_v5 }
 0x139   :  { %924 = vrot.lane.b32.xlu1 %v3049_v63, %s2882_s29  ;;  %5038 = vst [vmem:[#allocation44_spill] sm:$0xff] %v3359_v56 }
 0x13a   :  { %742 = vrot.lane.b32.xlu0 %v3131_v35, %s2881_s28 }
 0x13d   :  { %940 = vrot.lane.b32.xlu1 %v3055_v1, %s2882_s29 }
 0x13e   :  { %758 = vrot.lane.b32.xlu0 %v3142_v40, %s2881_s28 }
 0x141   :  { %1060 = vrot.lane.b32.xlu1 %v3049_v63, %s2883_s30 }
 0x142   :  { %926 = vrot.lane.b32.xlu0 %v3131_v35, %s2882_s29 }
 0x145   :  { %1076 = vrot.lane.b32.xlu1 %v3055_v1, %s2883_s30 }
 0x146   :  { %942 = vrot.lane.b32.xlu0 %v3142_v40, %s2882_s29 }
 0x149   :  { %1196 = vrot.lane.b32.xlu1 %v3049_v63, %s2884_s13 }
 0x14a   :  { %1062 = vrot.lane.b32.xlu0 %v3131_v35, %s2883_s30 }
 0x14d   :  { %598 = vrot.lane.b32.xlu1 %v3061_v3, %s2879_s26 }
 0x14e   :  { %1078 = vrot.lane.b32.xlu0 %v3142_v40, %s2883_s30 }
 0x151   :  { %614 = vrot.lane.b32.xlu1 %v3067_v7, %s2879_s26 }
 0x152   :  { %1198 = vrot.lane.b32.xlu0 %v3131_v35, %s2884_s13 }
 0x155   :  { %606 = vrot.lane.b32.xlu1 %v3131_v35, %s2879_s26 }
 0x156   :  { %355 = vrot.lane.b32.xlu0 %v3233_v45, %s2878_s25 }
 0x159   :  { %622 = vrot.lane.b32.xlu1 %v3142_v40, %s2879_s26 }
 0x15a   :  { %464 = vrot.lane.b32.xlu0 %v3244_v59, %s2880_s27 }
 0x15d   :  { %339 = vrot.lane.b32.xlu1 %v3244_v59, %s2878_s25 }
 0x15e   :  { %480 = vrot.lane.b32.xlu0 %v3233_v45, %s2880_s27 }
 0x15f   :  { %v3265_v21 = vpop.permute.xlu1 %335 }
 0x160   :  { %5023 = vst [vmem:[#allocation29_spill] sm:$0xff] %v3265_v21  ;;  %v3267_v27 = vpop.permute.xlu0 %612 }
 0x161   :  { %5024 = vst [vmem:[#allocation30_spill] sm:$0xff] %v3267_v27  ;;  %600 = vrot.lane.b32.xlu1 %v3244_v59, %s2879_s26 }
 0x162   :  { %616 = vrot.lane.b32.xlu0 %v3233_v45, %s2879_s26 }
 0x163   :  { %v3274_v37 = vpop.permute.xlu1 %351 }
 0x164   :  { %5025 = vst [vmem:[#allocation31_spill] sm:$0xff] %v3274_v37  ;;  %v3276_v42 = vpop.permute.xlu0 %604 }
 0x165   :  { %5026 = vst [vmem:[#allocation32_spill] sm:$0xff] %v3276_v42  ;;  %736 = vrot.lane.b32.xlu1 %v3244_v59, %s2881_s28 }
 0x166   :  { %752 = vrot.lane.b32.xlu0 %v3233_v45, %s2881_s28 }
 0x167   :  { %v3285_v52 = vpop.permute.xlu1 %460 }
 0x168   :  { %5027 = vst [vmem:[#allocation33_spill] sm:$0xff] %v3285_v52  ;;  %v3290_v62 = vpop.permute.xlu0 %620 }
 0x169   :  { %5029 = vst [vmem:[#allocation35_spill] sm:$0xff] %v3290_v62  ;;  %341 = vrot.lane.b32.xlu1 %v3283_v48, %s2878_s25 }
 0x16a   :  { %347 = vrot.lane.b32.xlu0 %v3288_v36, %s2878_s25 }
 0x16b   :  { %v3299_v54 = vpop.permute.xlu1 %476 }
 0x16c   :  { %5030 = vst [vmem:[#allocation36_spill] sm:$0xff] %v3299_v54  ;;  %v3304_v38 = vpop.permute.xlu0 %337 }
 0x16d   :  { %357 = vrot.lane.b32.xlu1 %v3297_v9, %s2878_s25 }
 0x16e   :  { %363 = vrot.lane.b32.xlu0 %v3302_v31, %s2878_s25 }
 0x16f   :  { %v3310_v51 = vpop.permute.xlu1 %596 }
 0x170   :  { %5032 = vst [vmem:[#allocation38_spill] sm:$0xff] %v3310_v51  ;;  %v3312_v6 = vpop.permute.xlu0 %353 }
 0x171   :  { %466 = vrot.lane.b32.xlu1 %v3283_v48, %s2880_s27 }
 0x172   :  { %472 = vrot.lane.b32.xlu0 %v3288_v36, %s2880_s27 }
 0x173   :  { %v3318_v0 = vpop.permute.xlu1 %732 }
 0x174   :  { %5033 = vst [vmem:[#allocation39_spill] sm:$0xff] %v3318_v0  ;;  %v3320_v41 = vpop.permute.xlu0 %462 }
 0x175   :  { %482 = vrot.lane.b32.xlu1 %v3297_v9, %s2880_s27 }
 0x176   :  { %488 = vrot.lane.b32.xlu0 %v3302_v31, %s2880_s27 }
 0x177   :  { %v3326_v24 = vpop.permute.xlu1 %748 }
 0x178   :  { %5034 = vst [vmem:[#allocation40_spill] sm:$0xff] %v3326_v24  ;;  %v3328_v25 = vpop.permute.xlu0 %478 }
 0x179   :  { %602 = vrot.lane.b32.xlu1 %v3283_v48, %s2879_s26 }
 0x17a   :  { %608 = vrot.lane.b32.xlu0 %v3288_v36, %s2879_s26 }
 0x17b   :  { %v3334_v15 = vpop.permute.xlu1 %916 }
 0x17c   :  { %5035 = vst [vmem:[#allocation41_spill] sm:$0xff] %v3334_v15  ;;  %v3336_v20 = vpop.permute.xlu0 %734 }
 0x17d   :  { %618 = vrot.lane.b32.xlu1 %v3297_v9, %s2879_s26 }
 0x17e   :  { %624 = vrot.lane.b32.xlu0 %v3302_v31, %s2879_s26 }
 0x17f   :  { %v3342_v58 = vpop.permute.xlu1 %932 }
 0x180   :  { %5036 = vst [vmem:[#allocation42_spill] sm:$0xff] %v3342_v58  ;;  %v3344_v57 = vpop.permute.xlu0 %750  ;;  %v2758_v58 = vpop.eup %2757 }
 0x181   :  { %738 = vrot.lane.b32.xlu1 %v3283_v48, %s2881_s28 }
 0x182   :  { %744 = vrot.lane.b32.xlu0 %v3288_v36, %s2881_s28 }
 0x183   :  { %v3350_v44 = vpop.permute.xlu1 %1052 }
 0x184   :  { %5037 = vst [vmem:[#allocation43_spill] sm:$0xff] %v3350_v44  ;;  %v3352_v13 = vpop.permute.xlu0 %918  ;;  %v3370_v44 = vmul.f32 %v2758_v58, %v3263_v11 }
 0x185   :  { %754 = vrot.lane.b32.xlu1 %v3297_v9, %s2881_s28 }
 0x186   :  { %760 = vrot.lane.b32.xlu0 %v3302_v31, %s2881_s28  ;;  %5040 = vst [vmem:[#allocation46_spill] sm:$0xff] %v3370_v44 }
 0x187   :  { %v3361_v15 = vpop.permute.xlu1 %1068 }
 0x188   :  { %5039 = vst [vmem:[#allocation45_spill] sm:$0xff] %v3361_v15  ;;  %v3363_v12 = vpop.permute.xlu0 %934 }
 0x189   :  { %349 = vrot.lane.b32.xlu1 %v3359_v56, %s2878_s25 }
 0x18a   :  { %1214 = vrot.lane.b32.xlu0 %v3142_v40, %s2884_s13 }
 0x18b   :  { %v3372_v28 = vpop.permute.xlu1 %1188 }
 0x18c   :  { %5041 = vst [vmem:[#allocation47_spill] sm:$0xff] %v3372_v28  ;;  %v3374_v24 = vpop.permute.xlu0 %1054 }
 0x18d   :  { %365 = vrot.lane.b32.xlu1 %v3370_v44, %s2878_s25 }
 0x18e   :  { %1324 = vrot.lane.b32.xlu0 %v3041_v60, %s2886_s14 }
 0x18f   :  { %v3380_v53 = vpop.permute.xlu1 %1204 }
 0x190   :  { %5042 = vst [vmem:[#allocation48_spill] sm:$0xff] %v3380_v53  ;;  %v3382_v5 = vpop.permute.xlu0 %1070 }
 0x191   :  { %474 = vrot.lane.b32.xlu1 %v3359_v56, %s2880_s27 }
 0x192   :  { %1332 = vrot.lane.b32.xlu0 %v3049_v63, %s2886_s14 }
 0x193   :  { %v3388_v11 = vpop.permute.xlu1 %343 }
 0x194   :  { %5043 = vst [vmem:[#allocation49_spill] sm:$0xff] %v3388_v11  ;;  %v3390_v58 = vpop.permute.xlu0 %1190 }
 0x195   :  { %5044 = vst [vmem:[#allocation50_spill] sm:$0xff] %v3390_v58  ;;  %490 = vrot.lane.b32.xlu1 %v3370_v44, %s2880_s27  ;;  %v3416_v58 = vand.u32 127, %v367_v30 }
 0x196   :  { %1340 = vrot.lane.b32.xlu0 %v3043_v61, %s2886_s14 }
 0x197   :  { %v3396_v28 = vpop.permute.xlu1 %359  ;;  %vm369_vm2 = vcmp.lt.s32.totalorder %v3416_v58, 17  ;;  %vm492_vm3 = vcmp.lt.s32.totalorder %v3416_v58, 16  ;;  %vm628_vm4 = vcmp.lt.s32.totalorder %v3416_v58, 15  ;;  %vm764_vm5 = vcmp.lt.s32.totalorder %v3416_v58, 1 }
 0x198   :  { %5045 = vst [vmem:[#allocation51_spill] sm:$0xff] %v3396_v28  ;;  %v3398_v53 = vpop.permute.xlu0 %1206  ;;  %v3434_v28 = vld [vmem:[%s4880_s5] ss:$8 sm:$0xf]  ;;  %vm948_vm6 = vcmp.lt.s32.totalorder %v3416_v58, 127  ;;  %vm1084_vm7 = vcmp.lt.s32.totalorder %v3416_v58, 113 }
 0x199   :  { %5046 = vst [vmem:[#allocation52_spill] sm:$0xff] %v3398_v53  ;;  %610 = vrot.lane.b32.xlu1 %v3359_v56, %s2879_s26  ;;  %v3418_v53 = vshrl.u32 %v367_v30, 7  ;;  %vm1356_vm8 = vcmp.lt.s32.totalorder %v3416_v58, 111  ;;  %vm1220_vm9 = vcmp.lt.s32.totalorder %v3416_v58, 112 }
 0x19a   :  { %1348 = vrot.lane.b32.xlu0 %v3055_v1, %s2886_s14 }
 0x19b   :  { %v3404_v15 = vpop.permute.xlu1 %468  ;;  %5049 = vst [vmem:[#allocation55_spill] sm:$0xff] %v3418_v53  ;;  %v3428_v54 = vsub.s32 0, %v3418_v53 }
 0x19c   :  { %5047 = vst [vmem:[#allocation53_spill] sm:$0xff] %v3404_v15  ;;  %v3406_v0 = vpop.permute.xlu0 %345  ;;  %v3425_v15 = vsub.s32 3, %v3418_v53 }
 0x19d   :  { %626 = vrot.lane.b32.xlu1 %v3370_v44, %s2879_s26  ;;  %5052 = vst [vmem:[#allocation58_spill] sm:$0xff] %v3428_v54  ;;  %v3446_v21 = vrot.slane %v3434_v28, %v3428_v54  ;;  %v379_v46 = vsel %vm369_vm2, %v3304_v38, %v3406_v0 }
 0x19e   :  { %920 = vrot.lane.b32.xlu0 %v3244_v59, %s2882_s29  ;;  %5051 = vst [vmem:[#allocation57_spill] sm:$0xff] %v3425_v15  ;;  %v3450_v11 = vrot.slane %v3434_v28, %v3425_v15 }
 0x19f   :  { %v3412_v32 = vpop.permute.xlu1 %484 }
 0x1a0   :  { %5048 = vst [vmem:[#allocation54_spill] sm:$0xff] %v3412_v32  ;;  %v362_v8 = vpop.permute.xlu0 %361  ;;  %5053 = vst [vmem:[#allocation59_spill] sm:$0xff] %v3450_v11 }
 0x1a1   :  { %746 = vrot.lane.b32.xlu1 %v3359_v56, %s2881_s28  ;;  %v371_v30 = vsel %vm369_vm2, %v3312_v6, %v362_v8 }
 0x1a2   :  { %928 = vrot.lane.b32.xlu0 %v3288_v36, %s2882_s29  ;;  %v415_v62 = vmul.f32 %v3450_v11, %v371_v30 }
 0x1a3   :  { %v3422_v52 = vpop.permute.xlu1 %740 }
 0x1a4   :  { %5050 = vst [vmem:[#allocation56_spill] sm:$0xff] %v3422_v52  ;;  %v471_v32 = vpop.permute.xlu0 %470  ;;  %v383_v52 = vsel %vm369_vm2, %v362_v8, %v3304_v38  ;;  %v2453_v8 = vld [vmem:[%s4880_s5 + $0x1] ss:$8 sm:$0xf]  ;;  %v451_v60 = vmul.f32 %v3093_v17, %v415_v62  ;;  %v375_v38 = vsel %vm369_vm2, %v3406_v0, %v3312_v6 }
 0x1a5   :  { %762 = vrot.lane.b32.xlu1 %v3370_v44, %s2881_s28  ;;  %v412_v51 = vmul.f32 %v3446_v21, %v383_v52  ;;  %v3463_v42 = vrot.slane %v2453_v8, %v3428_v54  ;;  %v3466_v27 = vrot.slane %v2453_v8, %v3425_v15  ;;  %v2456_v6 = vld [vmem:[%s4880_s5 + $0x5] ss:$8 sm:$0xf] }
 0x1a6   :  { %936 = vrot.lane.b32.xlu0 %v3233_v45, %s2882_s29 }
 0x1a7   :  { %v3458_v37 = vpop.permute.xlu1 %756  ;;  %5055 = vst [vmem:[#allocation61_spill] sm:$0xff] %v3463_v42  ;;  %5056 = vst [vmem:[#allocation62_spill] sm:$0xff] %v3466_v27  ;;  %v448_v33 = vmul.f32 %v3093_v17, %v412_v51  ;;  %v5060_v51 = vmov 7  }
 0x1a8   :  { %5054 = vst [vmem:[#allocation60_spill] sm:$0xff] %v3458_v37  ;;  %v487_v55 = vpop.permute.xlu0 %486 }
 0x1a9   :  { %v494_v61 = vsel %vm492_vm3, %v3328_v25, %v487_v55  ;;  %v506_v63 = vsel %vm492_vm3, %v487_v55, %v3320_v41  ;;  %1212 = vrot.lane.b32.xlu1 %v3055_v1, %s2884_s13 }
 0x1aa   :  { %v536_v52 = vmul.f32 %v3463_v42, %v506_v63  ;;  %v539_v30 = vmul.f32 %v3466_v27, %v494_v61  ;;  %944 = vrot.lane.b32.xlu0 %v3302_v31, %s2882_s29  ;;  %v3581_v27 = vmul.f32 %v3228_v34, %v3142_v40 }
 0x1ab   :  { %v3480_v37 = vpop.permute.xlu1 %924 }
 0x1ac   :  { %5057 = vst [vmem:[#allocation63_spill] sm:$0xff] %v3480_v37  ;;  %v568_v22 = vmul.f32 %v3099_v26, %v536_v52  ;;  %v571_v55 = vmul.f32 %v3099_v26, %v539_v30  ;;  %v743_v10 = vpop.permute.xlu0 %742 }
 0x1ad   :  { %1413 = vperm.xlu1 %2645, %v2988_v14   ;;  %v770_v11 = vsel %vm764_vm5, %v743_v10, %v3344_v57 }
 0x1ae   :  { %v3487_v1 = vadd.f32 %v568_v22, %v448_v33  ;;  %v3489_v63 = vadd.f32 %v571_v55, %v451_v60  ;;  %1149 = vperm.xlu0 %2643, %v3005_v18   ;;  %v3503_v60 = vsub.s32 2, %v3418_v53  ;;  %v502_v55 = vsel %vm492_vm3, %v3320_v41, %v471_v32 }
 0x1af   :  { %v3492_v61 = vpop.permute.xlu1 %940 }
 0x1b0   :  { %5058 = vst [vmem:[#allocation64_spill] sm:$0xff] %v3492_v61  ;;  %v759_v37 = vpop.permute.xlu0 %758  ;;  %5062 = vst [vmem:[#allocation66_spill] sm:$0xff] %v3503_v60  ;;  %v498_v61 = vsel %vm492_vm3, %v471_v32, %v3328_v25  ;;  %v3560_v25 = vrot.slane %v2453_v8, %v3503_v60  ;;  %v2455_v32 = vld [vmem:[%s4880_s5 + $0x3] ss:$8 sm:$0xf]  ;;  %v3644_v59 = vrot.slane %v2456_v6, %v3503_v60 }
 0x1b1   :  { %2646 = vset.pattern.permute.xlu1 %v5059_v49  ;;  %v2454_v49 = vld [vmem:[%s4880_s5 + $0x2] ss:$8 sm:$0xf]  ;;  %v3613_v43 = vrot.slane %v2455_v32, %v3428_v54 }
 0x1b2   :  { %2647 = vset.pattern.permute.xlu0 %v5060_v51  ;;  %1013 = vperm.xlu1 %2646, %v3005_v18   ;;  %v3519_v52 = vrot.slane %v2454_v49, %v3503_v60  ;;  %v3522_v30 = vrot.slane %v2454_v49, %v3425_v15  ;;  %5067 = vst [vmem:[#allocation71_spill] sm:$0xff] %v3560_v25  ;;  %5071 = vst [vmem:[#allocation74_spill] sm:$0xff] %v3644_v59 }
 0x1b3   :  { %1281 = vperm.xlu0 %2647, %v2996_v16   ;;  %v3497_v62 = vpop.permute.xlu1 %1060  ;;  %v3513_v16 = vsub.s32 1, %v3418_v53  ;;  %v3532_v53 = vrot.slane %v2454_v49, %v3428_v54  ;;  %v538_v42 = vmul.f32 %v3560_v25, %v498_v61  ;;  %v774_v61 = vsel %vm764_vm5, %v3336_v20, %v743_v10 }
 0x1b4   :  { %5061 = vst [vmem:[#allocation65_spill] sm:$0xff] %v3497_v62  ;;  %v3500_v14 = vpop.permute.xlu0 %926 }
 0x1b5   :  { %5064 = vst [vmem:[#allocation68_spill] sm:$0xff] %v3513_v16  ;;  %v3538_v62 = vrot.slane %v2453_v8, %v3513_v16  ;;  %v3572_v2 = vrot.slane %v3434_v28, %v3513_v16  ;;  %v570_v51 = vmul.f32 %v3099_v26, %v538_v42  ;;  %v3635_v10 = vrot.slane %v2456_v6, %v3513_v16 }
 0x1b6   :  { %1017 = vperm.xlu1 %2646, %v3022_v23   ;;  %v3535_v23 = vrot.slane %v2454_v49, %v3513_v16  ;;  %v3553_v49 = vmul.f32 %v3228_v34, %v3067_v7 }
 0x1b7   :  { %1064 = vrot.lane.b32.xlu0 %v3288_v36, %s2883_s30  ;;  %v3507_v33 = vpop.permute.xlu1 %1076  ;;  %5066 = vst [vmem:[#allocation70_spill] sm:$0xff] %v3538_v62  ;;  %v537_v8 = vmul.f32 %v3538_v62, %v502_v55  ;;  %v3599_v55 = vrot.slane %v2455_v32, %v3513_v16  ;;  %5070 = vst [vmem:[#allocation73_spill] sm:$0xff] %v3635_v10 }
 0x1b8   :  { %5063 = vst [vmem:[#allocation67_spill] sm:$0xff] %v3507_v33  ;;  %v3516_v22 = vpop.permute.xlu0 %942 }
 0x1b9   :  { %v569_v39 = vmul.f32 %v3099_v26, %v537_v8  ;;  %v809_v25 = vmul.f32 %v3599_v55, %v774_v61  ;;  %v778_v8 = vsel %vm764_vm5, %v759_v37, %v3336_v20  ;;  %v3647_v26 = vrot.slane %v2456_v6, %v3425_v15 }
 0x1ba   :  { %1326 = vrot.lane.b32.xlu1 %v3061_v3, %s2886_s14  ;;  %v808_v61 = vmul.f32 %v3613_v43, %v778_v8 }
 0x1bb   :  { %1072 = vrot.lane.b32.xlu0 %v3233_v45, %s2883_s30  ;;  %v3529_v33 = vpop.permute.xlu1 %1196  ;;  %2648 = vset.pattern.permute.xlu1 %v5068_v19  ;;  %v3586_v19 = vrot.slane %v3434_v28, %v3503_v60  ;;  %v3602_v28 = vrot.slane %v2455_v32, %v3503_v60 }
 0x1bc   :  { %5065 = vst [vmem:[#allocation69_spill] sm:$0xff] %v3529_v33  ;;  %v3545_v41 = vpop.permute.xlu0 %1062  ;;  %v3549_v33 = vmul.f32 %v3228_v34, %v3061_v3  ;;  %v3568_v3 = vmul.f32 %v3228_v34, %v3131_v35  ;;  %v413_v34 = vmul.f32 %v3572_v2, %v379_v46  ;;  %v3616_v46 = vrot.slane %v2455_v32, %v3425_v15  ;;  %v2457_v32 = vld [vmem:[%s4880_s5 + $0x6] ss:$8 sm:$0xf] }
 0x1bd   :  { %v810_v36 = vmul.f32 %v3602_v28, %v770_v11  ;;  %v3659_v11 = vrot.slane %v2457_v32, %v3513_v16 }
 0x1be   :  { %1334 = vrot.lane.b32.xlu1 %v3131_v35, %s2886_s14  ;;  %v3624_v35 = vrot.slane %v2456_v6, %v3428_v54  ;;  %v3663_v6 = vrot.slane %v2457_v32, %v3503_v60 }
 0x1bf   :  { %1080 = vrot.lane.b32.xlu0 %v3302_v31, %s2883_s30  ;;  %v3595_v0 = vpop.permute.xlu1 %598  ;;  %v414_v31 = vmul.f32 %v3586_v19, %v375_v38  ;;  %v766_v38 = vsel %vm764_vm5, %v3344_v57, %v759_v37  ;;  %v449_v57 = vmul.f32 %v3093_v17, %v413_v34  ;;  %v3656_v37 = vrot.slane %v2457_v32, %v3428_v54 }
 0x1c0   :  { %v3609_v45 = vpop.permute.xlu0 %1078  ;;  %5069 = vst [vmem:[#allocation72_spill] sm:$0xff] %v3624_v35  ;;  %5074 = vst [vmem:[#allocation77_spill] sm:$0xff] %v3659_v11 }
 0x1c1   :  { %v450_v20 = vmul.f32 %v3093_v17, %v414_v31  ;;  %5073 = vst [vmem:[#allocation76_spill] sm:$0xff] %v3656_v37  ;;  %v585_v34 = vadd.f32 %v569_v39, %v449_v57  ;;  %5075 = vst [vmem:[#allocation78_spill] sm:$0xff] %v3663_v6  ;;  %v841_v17 = vmul.f32 %v3115_v29, %v809_v25  ;;  %v2843_v25 = vld [vmem:[%s4878_s3 + $0x8] sm:$0xff] }
 0x1c2   :  { %1342 = vrot.lane.b32.xlu1 %v3067_v7, %s2886_s14  ;;  %v3666_v7 = vrot.slane %v2457_v32, %v3425_v15  ;;  %v954_v31 = vsel %vm948_vm6, %v3500_v14, %v3363_v12  ;;  %v958_v39 = vsel %vm948_vm6, %v3352_v13, %v3500_v14  ;;  %v842_v57 = vmul.f32 %v3115_v29, %v810_v36 }
 0x1c3   :  { %1285 = vperm.xlu0 %2647, %v3005_v18   ;;  %v615_v62 = vpop.permute.xlu1 %614  ;;  %v811_v18 = vmul.f32 %v3616_v46, %v766_v38  ;;  %v5077_v38 = vmov 8   ;;  %v992_v60 = vmul.f32 %v3624_v35, %v958_v39  ;;  %v993_v16 = vmul.f32 %v3635_v10, %v954_v31 }
 0x1c4   :  { %v3651_v42 = vpop.permute.xlu0 %1198  ;;  %5076 = vst [vmem:[#allocation79_spill] sm:$0xff] %v3666_v7 }
 0x1c5   :  { %5072 = vst [vmem:[#allocation75_spill] sm:$0xff] %v3651_v42  ;;  %v586_v42 = vadd.f32 %v570_v51, %v450_v20  ;;  %v843_v36 = vmul.f32 %v3115_v29, %v811_v18  ;;  %v962_v18 = vsel %vm948_vm6, %v3516_v22, %v3352_v13 }
 0x1c6   :  { %1350 = vrot.lane.b32.xlu1 %v3142_v40, %s2886_s14  ;;  %v950_v40 = vsel %vm948_vm6, %v3363_v12, %v3516_v22  ;;  %v1090_v12 = vsel %vm1084_vm7, %v3545_v41, %v3382_v5 }
 0x1c7   :  { %2650 = vset.pattern.permute.xlu0 %v5077_v38  ;;  %v607_v8 = vpop.permute.xlu1 %606  ;;  %v994_v39 = vmul.f32 %v3644_v59, %v950_v40  ;;  %v1129_v59 = vmul.f32 %v3659_v11, %v1090_v12 }
 0x1c8   :  { %v3682_v51 = vpop.permute.xlu0 %355  ;;  %1417 = vperm.xlu0 %2650, %v2843_v25   ;;  %v634_v14 = vsel %vm628_vm4, %v607_v8, %v615_v62  ;;  %v638_v32 = vsel %vm628_vm4, %v3595_v0, %v607_v8  ;;  %v840_v25 = vmul.f32 %v3115_v29, %v808_v61  ;;  %v1086_v8 = vsel %vm1084_vm7, %v3382_v5, %v3609_v45 }
 0x1c9   :  { %v673_v20 = vmul.f32 %v3535_v23, %v638_v32  ;;  %v674_v15 = vmul.f32 %v3519_v52, %v634_v14  ;;  %v1026_v12 = vmul.f32 %v3162_v47, %v994_v39 }
 0x1ca   :  { %922 = vrot.lane.b32.xlu1 %v3283_v48, %s2882_s29 }
 0x1cb   :  { %v705_v29 = vmul.f32 %v3170_v50, %v673_v20  ;;  %v706_v61 = vmul.f32 %v3170_v50, %v674_v15  ;;  %v623_v31 = vpop.permute.xlu1 %622  ;;  %v1094_v20 = vsel %vm1084_vm7, %v3374_v24, %v3545_v41  ;;  %v995_v41 = vmul.f32 %v3647_v26, %v962_v18 }
 0x1cc   :  { %v3719_v13 = vpop.permute.xlu0 %464  ;;  %1194 = vrot.lane.b32.xlu0 %v3283_v48, %s2884_s13  ;;  %v630_v22 = vsel %vm628_vm4, %v615_v62, %v623_v31  ;;  %v642_v5 = vsel %vm628_vm4, %v623_v31, %v3595_v0  ;;  %v1098_v62 = vsel %vm1084_vm7, %v3609_v45, %v3374_v24  ;;  %v1130_v0 = vmul.f32 %v3663_v6, %v1086_v8 }
 0x1cd   :  { %v721_v14 = vadd.f32 %v705_v29, %v585_v34  ;;  %v722_v15 = vadd.f32 %v706_v61, %v586_v42  ;;  %v672_v32 = vmul.f32 %v3532_v53, %v642_v5  ;;  %v675_v40 = vmul.f32 %v3522_v30, %v630_v22 }
 0x1ce   :  { %v1025_v22 = vmul.f32 %v3162_v47, %v993_v16  ;;  %930 = vrot.lane.b32.xlu1 %v3359_v56, %s2882_s29  ;;  %v1131_v18 = vmul.f32 %v3666_v7, %v1098_v62  ;;  %v1162_v8 = vmul.f32 %v3250_v4, %v1130_v0  ;;  %v2664_v7 = vld [vmem:[%s4883_s8 + $0xb8] sm:$0xff]  }
 0x1cf   :  { %v857_v34 = vadd.f32 %v841_v17, %v721_v14  ;;  %v858_v42 = vadd.f32 %v842_v57, %v722_v15  ;;  %v704_v29 = vmul.f32 %v3170_v50, %v672_v32  ;;  %v707_v61 = vmul.f32 %v3170_v50, %v675_v40  ;;  %v340_v31 = vpop.permute.xlu1 %339 }
 0x1d0   :  { %v3747_v5 = vpop.permute.xlu0 %480  ;;  %1202 = vrot.lane.b32.xlu0 %v3359_v56, %s2884_s13  ;;  %v1128_v17 = vmul.f32 %v3656_v37, %v1094_v20  ;;  %v1161_v57 = vmul.f32 %v3250_v4, %v1129_v59 }
 0x1d1   :  { %v905_v24 = vadd.f32 %v3568_v3, %v857_v34  ;;  %v906_v45 = vadd.f32 %v3553_v49, %v858_v42  ;;  %v720_v50 = vadd.f32 %v704_v29, %v3487_v1  ;;  %v723_v16 = vadd.f32 %v707_v61, %v3489_v63 }
 0x1d2   :  { %v1024_v49 = vmul.f32 %v3162_v47, %v992_v60  ;;  %v1027_v1 = vmul.f32 %v3162_v47, %v995_v41  ;;  %938 = vrot.lane.b32.xlu1 %v3297_v9, %s2882_s29  ;;  %v1160_v60 = vmul.f32 %v3250_v4, %v1128_v17  ;;  %v1163_v47 = vmul.f32 %v3250_v4, %v1131_v18  ;;  %v3794_v4 = vld [vmem:[%s4878_s3 + $0x18] sm:$0xff] }
 0x1d3   :  { %v856_v39 = vadd.f32 %v840_v25, %v720_v50  ;;  %v859_v14 = vadd.f32 %v843_v36, %v723_v16  ;;  %v3759_v15 = vpop.permute.xlu1 %600  ;;  %v1041_v32 = vadd.f32 %v1025_v22, %v905_v24  ;;  %v1042_v3 = vadd.f32 %v1026_v12, %v906_v45  ;;  %v1460_v12 = vld [vmem:[%s4879_s4] sm:$0xff]  ;;  %v1461_v24 = vld [vmem:[%s4879_s4 + $0x8] sm:$0xff] }
 0x1d4   :  { %v3765_v63 = vpop.permute.xlu0 %616  ;;  %1210 = vrot.lane.b32.xlu0 %v3297_v9, %s2884_s13  ;;  %v5080_v50 = vmov 0  }
 0x1d5   :  { %v904_v59 = vadd.f32 %v3549_v33, %v856_v39  ;;  %v907_v36 = vadd.f32 %v3581_v27, %v859_v14  ;;  %v3771_v25 = vadd.f32 %v1161_v57, %v1041_v32  ;;  %v3773_v40 = vadd.f32 %v1162_v8, %v1042_v3  ;;  %v5081_v3 = vld [vmem:[#allocation27_spill] sm:$0xff] }
 0x1d6   :  { %946 = vrot.lane.b32.xlu1 %v3370_v44, %s2882_s29 }
 0x1d7   :  { %5078 = vst [vmem:[#allocation80_spill] sm:$0xff] %v3773_v40  ;;  %v3777_v20 = vpop.permute.xlu1 %736  ;;  %v1040_v62 = vadd.f32 %v1024_v49, %v904_v59  ;;  %v1043_v0 = vadd.f32 %v1027_v1, %v907_v36  ;;  %v5083_v49 = vld [vmem:[#allocation70_spill] sm:$0xff]  ;;  %v5084_v59 = vld [vmem:[#allocation71_spill] sm:$0xff] }
 0x1d8   :  { %v3781_v34 = vpop.permute.xlu0 %752  ;;  %1218 = vrot.lane.b32.xlu0 %v3370_v44, %s2884_s13 }
 0x1d9   :  { %v3785_v27 = vadd.f32 %v1160_v60, %v1040_v62  ;;  %v3787_v33 = vadd.f32 %v1163_v47, %v1043_v0  ;;  %v5085_v60 = vmov 7   ;;  %v5086_v47 = vld [vmem:[#allocation13_spill] sm:$0xff] }
 0x1da   :  { %1153 = vperm.xlu1 %2648, %v3794_v4  }
 0x1db   :  { %5079 = vst [vmem:[#allocation81_spill] sm:$0xff] %v3787_v33  ;;  %v3789_v42 = vpop.permute.xlu1 %341  ;;  %v2692_v33 = vld [vmem:[%s4883_s8 + $0x80] sm:$0xff]  }
 0x1dc   :  { %v348_v29 = vpop.permute.xlu0 %347  ;;  %1425 = vperm.xlu0 %2650, %v3794_v4  }
 0x1dd   :  { %v376_v61 = vsel %vm369_vm2, %v348_v29, %v3682_v51  ;;  %v380_v22 = vsel %vm369_vm2, %v340_v31, %v348_v29 }
 0x1de   :  { %v417_v41 = vmul.f32 %v3572_v2, %v380_v22  ;;  %2649 = vset.pattern.permute.xlu1 %v5080_v50  ;;  %v418_v39 = vmul.f32 %v3586_v19, %v376_v61  ;;  %v5087_v61 = vld [vmem:[#allocation59_spill] sm:$0xff] }
 0x1df   :  { %v3810_v45 = vpop.permute.xlu1 %357  ;;  %1466 = vperm.xlu1 %2649, %v1460_v12   ;;  %v5088_v12 = vld [vmem:[#allocation14_spill] sm:$0xff] }
 0x1e0   :  { %v364_v16 = vpop.permute.xlu0 %363  ;;  %2653 = vset.pattern.permute.xlu0 %v5080_v50  ;;  %v453_v62 = vmul.f32 %v5086_v47, %v417_v41  ;;  %v454_v29 = vmul.f32 %v5086_v47, %v418_v39  ;;  %v5089_v41 = vld [vmem:[#allocation24_spill] sm:$0xff] }
 0x1e1   :  { %v372_v17 = vsel %vm369_vm2, %v3682_v51, %v364_v16  ;;  %v384_v57 = vsel %vm369_vm2, %v364_v16, %v340_v31  ;;  %1471 = vperm.xlu0 %2653, %v1461_v24   ;;  %v5082_v31 = vld [vmem:[#allocation34_spill] sm:$0xff]  ;;  %v2662_v39 = vld [vmem:[%s4883_s8 + $0xf8] sm:$0xff]  }
 0x1e2   :  { %v416_v18 = vmul.f32 %v3446_v21, %v384_v57  ;;  %v419_v22 = vmul.f32 %v5087_v61, %v372_v17  ;;  %v2661_v17 = vld [vmem:[%s4883_s8 + $0x78] sm:$0xff]   ;;  %2555 = vmatprep.subr.bf16.mxu1 %v2662_v39 }
 0x1e3   :  { %v3820_v8 = vpop.permute.xlu1 %466  ;;  %1056 = vrot.lane.b32.xlu1 %v5081_v3, %s2883_s30  ;;  %2527 = vmatprep.subr.bf16.mxu0 %v2661_v17 }
 0x1e4   :  { %v473_v14 = vpop.permute.xlu0 %472  ;;  %2651 = vset.pattern.permute.xlu1 %v5085_v60  ;;  %v5091_v60 = vld [vmem:[#allocation62_spill] sm:$0xff]  ;;  %v452_v37 = vmul.f32 %v5086_v47, %v416_v18  ;;  %2556 = vmatpush3.bf16.msra.mxu1 %v2664_v7  ;;  %v2666_v7 = vld [vmem:[%s4883_s8 + $0xf0] sm:$0xff]  }
 0x1e5   :  { %v499_v32 = vsel %vm492_vm3, %v473_v14, %v3747_v5  ;;  %v503_v51 = vsel %vm492_vm3, %v3719_v13, %v473_v14  ;;  %1336 = vrot.lane.b32.xlu0 %v5082_v31, %s2886_s14  ;;  %2557 = vmatprep.subr.bf16.mxu1 %v2666_v7  ;;  %v2670_v7 = vld [vmem:[%s4883_s8 + $0xe8] sm:$0xff]  }
 0x1e6   :  { %v541_v1 = vmul.f32 %v5083_v49, %v503_v51  ;;  %v542_v36 = vmul.f32 %v5084_v59, %v499_v32 }
 0x1e7   :  { %v3837_v0 = vpop.permute.xlu1 %482  ;;  %1058 = vrot.lane.b32.xlu1 %v3283_v48, %s2883_s30 }
 0x1e8   :  { %v573_v24 = vmul.f32 %v5088_v12, %v541_v1  ;;  %v574_v16 = vmul.f32 %v5088_v12, %v542_v36  ;;  %v489_v57 = vpop.permute.xlu0 %488  ;;  %v5090_v1 = vld [vmem:[#allocation61_spill] sm:$0xff] }
 0x1e9   :  { %v495_v14 = vsel %vm492_vm3, %v3747_v5, %v489_v57  ;;  %v507_v32 = vsel %vm492_vm3, %v489_v57, %v3719_v13  ;;  %1344 = vrot.lane.b32.xlu0 %v5089_v41, %s2886_s14  ;;  %v2663_v57 = vld [vmem:[%s4883_s8 + $0x38] sm:$0xff]  }
 0x1ea   :  { %v589_v51 = vadd.f32 %v573_v24, %v453_v62  ;;  %v590_v5 = vadd.f32 %v574_v16, %v454_v29  ;;  %v540_v36 = vmul.f32 %v5090_v1, %v507_v32  ;;  %v543_v13 = vmul.f32 %v5091_v60, %v495_v14  ;;  %2528 = vmatpush3.bf16.msra.mxu0 %v2663_v57  ;;  %v2668_v57 = vld [vmem:[%s4883_s8 + $0xb0] sm:$0xff]  }
 0x1eb   :  { %v3868_v6 = vpop.permute.xlu1 %602  ;;  %v455_v62 = vmul.f32 %v5086_v47, %v419_v22  ;;  %1066 = vrot.lane.b32.xlu1 %v3359_v56, %s2883_s30  ;;  %v5092_v47 = vld [vmem:[#allocation37_spill] sm:$0xff]  ;;  %v2665_v22 = vld [vmem:[%s4883_s8 + $0x70] sm:$0xff]   ;;  %2558 = vmatpush3.bf16.msra.mxu1 %v2668_v57 }
 0x1ec   :  { %v572_v29 = vmul.f32 %v5088_v12, %v540_v36  ;;  %v575_v24 = vmul.f32 %v5088_v12, %v543_v13  ;;  %v609_v16 = vpop.permute.xlu0 %608  ;;  %v1462_v36 = vld [vmem:[%s4879_s4 + $0x10] sm:$0xff]  ;;  %2529 = vmatprep.subr.bf16.mxu0 %v2665_v22  ;;  %v2669_v22 = vld [vmem:[%s4883_s8 + $0x68] sm:$0xff]   ;;  %2559 = vmatprep.subr.bf16.mxu1 %v2670_v7 }
 0x1ed   :  { %v635_v14 = vsel %vm628_vm4, %v609_v16, %v3765_v63  ;;  %v639_v18 = vsel %vm628_vm4, %v3759_v15, %v609_v16  ;;  %1352 = vrot.lane.b32.xlu0 %v5092_v47, %s2886_s14  ;;  %v2667_v13 = vld [vmem:[%s4883_s8 + $0x30] sm:$0xff]  }
 0x1ee   :  { %v588_v12 = vadd.f32 %v572_v29, %v452_v37  ;;  %v591_v32 = vadd.f32 %v575_v24, %v455_v62  ;;  %v677_v17 = vmul.f32 %v3535_v23, %v639_v18  ;;  %v678_v39 = vmul.f32 %v3519_v52, %v635_v14  ;;  %v5093_v37 = vld [vmem:[#allocation18_spill] sm:$0xff]  ;;  %2530 = vmatpush3.bf16.msra.mxu0 %v2667_v13 }
 0x1ef   :  { %v3900_v16 = vpop.permute.xlu1 %618  ;;  %1074 = vrot.lane.b32.xlu1 %v3297_v9, %s2883_s30  ;;  %2531 = vmatprep.subr.bf16.mxu0 %v2669_v22 }
 0x1f0   :  { %v709_v62 = vmul.f32 %v5093_v37, %v677_v17  ;;  %v710_v29 = vmul.f32 %v5093_v37, %v678_v39  ;;  %v625_v24 = vpop.permute.xlu0 %624 }
 0x1f1   :  { %v631_v14 = vsel %vm628_vm4, %v3765_v63, %v625_v24  ;;  %v643_v18 = vsel %vm628_vm4, %v625_v24, %v3759_v15  ;;  %1476 = vperm.xlu0 %2653, %v1462_v36   ;;  %v2671_v15 = vld [vmem:[%s4883_s8 + $0x28] sm:$0xff]  }
 0x1f2   :  { %v725_v17 = vadd.f32 %v709_v62, %v589_v51  ;;  %v726_v39 = vadd.f32 %v710_v29, %v590_v5  ;;  %v676_v63 = vmul.f32 %v3532_v53, %v643_v18  ;;  %v679_v13 = vmul.f32 %v3522_v30, %v631_v14  ;;  %v2672_v36 = vld [vmem:[%s4883_s8 + $0xa8] sm:$0xff]   ;;  %2532 = vmatpush3.bf16.msra.mxu0 %v2671_v15  ;;  %v2673_v14 = vld [vmem:[%s4883_s8 + $0x60] sm:$0xff]  }
 0x1f3   :  { %v3926_v57 = vpop.permute.xlu1 %738  ;;  %2560 = vmatpush3.bf16.msra.mxu1 %v2672_v36  ;;  %1082 = vrot.lane.b32.xlu1 %v3370_v44, %s2883_s30  ;;  %v2676_v15 = vld [vmem:[%s4883_s8 + $0xa0] sm:$0xff]  }
 0x1f4   :  { %v708_v24 = vmul.f32 %v5093_v37, %v676_v63  ;;  %v711_v51 = vmul.f32 %v5093_v37, %v679_v13  ;;  %v745_v5 = vpop.permute.xlu0 %744  ;;  %v2674_v37 = vld [vmem:[%s4883_s8 + $0xe0] sm:$0xff]   ;;  %2533 = vmatprep.subr.bf16.mxu0 %v2673_v14 }
 0x1f5   :  { %v771_v62 = vsel %vm764_vm5, %v745_v5, %v3781_v34  ;;  %v775_v29 = vsel %vm764_vm5, %v3777_v20, %v745_v5  ;;  %v2675_v13 = vld [vmem:[%s4883_s8 + $0x20] sm:$0xff]   ;;  %2561 = vmatprep.subr.bf16.mxu1 %v2674_v37  ;;  %v5094_v5 = vld [vmem:[#allocation22_spill] sm:$0xff] }
 0x1f6   :  { %v724_v18 = vadd.f32 %v708_v24, %v588_v12  ;;  %v727_v22 = vadd.f32 %v711_v51, %v591_v32  ;;  %v813_v7 = vmul.f32 %v3599_v55, %v775_v29  ;;  %v814_v63 = vmul.f32 %v3602_v28, %v771_v62  ;;  %2534 = vmatpush3.bf16.msra.mxu0 %v2675_v13  ;;  %v2677_v62 = vld [vmem:[%s4883_s8 + $0x58] sm:$0xff]  }
 0x1f7   :  { %v3952_v36 = vpop.permute.xlu1 %754  ;;  %2562 = vmatpush3.bf16.msra.mxu1 %v2676_v15  ;;  %1289 = vperm.xlu1 %2651, %v3794_v4   ;;  %v2678_v29 = vld [vmem:[%s4883_s8 + $0xd8] sm:$0xff]  }
 0x1f8   :  { %v845_v11 = vmul.f32 %v5094_v5, %v813_v7  ;;  %v846_v12 = vmul.f32 %v5094_v5, %v814_v63  ;;  %v761_v32 = vpop.permute.xlu0 %760  ;;  %2535 = vmatprep.subr.bf16.mxu0 %v2677_v62  ;;  %2563 = vmatprep.subr.bf16.mxu1 %v2678_v29  ;;  %v2680_v63 = vld [vmem:[%s4883_s8 + $0x98] sm:$0xff]  }
 0x1f9   :  { %v767_v24 = vsel %vm764_vm5, %v3781_v34, %v761_v32  ;;  %v779_v51 = vsel %vm764_vm5, %v761_v32, %v3777_v20  ;;  %v2679_v20 = vld [vmem:[%s4883_s8 + $0x18] sm:$0xff]  }
 0x1fa   :  { %v3969_v14 = vadd.f32 %v845_v11, %v725_v17  ;;  %v3971_v37 = vadd.f32 %v846_v12, %v726_v39  ;;  %v812_v34 = vmul.f32 %v3613_v43, %v779_v51  ;;  %v815_v7 = vmul.f32 %v3616_v46, %v767_v24  ;;  %2536 = vmatpush3.bf16.msra.mxu0 %v2679_v20  ;;  %v2681_v12 = vld [vmem:[%s4883_s8 + $0x50] sm:$0xff]   ;;  %v2685_v20 = vld [vmem:[%s4883_s8 + $0x48] sm:$0xff]  }
 0x1fb   :  { %v350_v4 = vpop.permute.xlu1 %349  ;;  %1192 = vrot.lane.b32.xlu1 %v5081_v3, %s2884_s13  ;;  %v2683_v51 = vld [vmem:[%s4883_s8 + $0x10] sm:$0xff]   ;;  %2564 = vmatpush3.bf16.msra.mxu1 %v2680_v63 }
 0x1fc   :  { %v844_v11 = vmul.f32 %v5094_v5, %v812_v34  ;;  %v847_v17 = vmul.f32 %v5094_v5, %v815_v7  ;;  %v3983_v39 = vpop.permute.xlu0 %1214  ;;  %v377_v13 = vsel %vm369_vm2, %v350_v4, %v3810_v45  ;;  %v381_v15 = vsel %vm369_vm2, %v3789_v42, %v350_v4  ;;  %v2682_v5 = vld [vmem:[%s4883_s8 + $0xd0] sm:$0xff]   ;;  %2652 = vset.pattern.permute.xlu1 %v5077_v38  ;;  %v2686_v4 = vld [vmem:[%s4883_s8 + $0xc8] sm:$0xff]  }
 0x1fd   :  { %v421_v62 = vmul.f32 %v3572_v2, %v381_v15  ;;  %2537 = vmatprep.subr.bf16.mxu0 %v2681_v12  ;;  %v2684_v34 = vld [vmem:[%s4883_s8 + $0x90] sm:$0xff]   ;;  %2565 = vmatprep.subr.bf16.mxu1 %v2682_v5 }
 0x1fe   :  { %v3999_v32 = vadd.f32 %v844_v11, %v724_v18  ;;  %v4001_v24 = vadd.f32 %v847_v17, %v727_v22  ;;  %2538 = vmatpush3.bf16.msra.mxu0 %v2683_v51  ;;  %v2688_v11 = vld [vmem:[%s4883_s8 + $0x88] sm:$0xff]  }
 0x1ff   :  { %v366_v29 = vpop.permute.xlu1 %365  ;;  %1200 = vrot.lane.b32.xlu1 %v5082_v31, %s2884_s13  ;;  %2566 = vmatpush3.bf16.msra.mxu1 %v2684_v34  ;;  %v2690_v34 = vld [vmem:[%s4883_s8 + $0xc0] sm:$0xff]  }
 0x200   :  { %v4011_v7 = vpop.permute.xlu0 %1324  ;;  %v373_v18 = vsel %vm369_vm2, %v3810_v45, %v366_v29  ;;  %v385_v38 = vsel %vm369_vm2, %v366_v29, %v3789_v42  ;;  %v2687_v42 = vld [vmem:[%s4883_s8 + $0x8] sm:$0xff]   ;;  %v422_v45 = vmul.f32 %v3586_v19, %v377_v13  ;;  %2539 = vmatprep.subr.bf16.mxu0 %v2685_v20  ;;  %2567 = vmatprep.subr.bf16.mxu1 %v2686_v4  ;;  %v2689_v29 = vld [vmem:[%s4883_s8 + $0x40] sm:$0xff]  }
 0x201   :  { %5095 = vst [vmem:[#allocation27_spill] sm:$0xff] %v4011_v7  ;;  %v420_v22 = vmul.f32 %v3446_v21, %v385_v38  ;;  %v5097_v38 = vld [vmem:[#allocation15_spill] sm:$0xff]  ;;  %v2691_v4 = vld [vmem:[%s4883_s8] sm:$0xff]  }
 0x202   :  { %v457_v20 = vmul.f32 %v5097_v38, %v421_v62  ;;  %2540 = vmatpush3.bf16.msra.mxu0 %v2687_v42  ;;  %v423_v62 = vmul.f32 %v5087_v61, %v373_v18 }
 0x203   :  { %v475_v63 = vpop.permute.xlu1 %474  ;;  %1208 = vrot.lane.b32.xlu1 %v5089_v41, %s2884_s13  ;;  %2568 = vmatpush3.bf16.msra.mxu1 %v2688_v11 }
 0x204   :  { %v1333_v17 = vpop.permute.xlu0 %1332  ;;  %v500_v15 = vsel %vm492_vm3, %v475_v63, %v3837_v0  ;;  %v504_v12 = vsel %vm492_vm3, %v3820_v8, %v475_v63  ;;  %v458_v63 = vmul.f32 %v5097_v38, %v422_v45  ;;  %2541 = vmatprep.subr.bf16.mxu0 %v2689_v29  ;;  %2569 = vmatprep.subr.bf16.mxu1 %v2690_v34 }
 0x205   :  { %v4045_v13 = vsel %vm1356_vm8, %v4011_v7, %v1333_v17  ;;  %v545_v5 = vmul.f32 %v5083_v49, %v504_v12  ;;  %v546_v51 = vmul.f32 %v5084_v59, %v500_v15  ;;  %v5098_v12 = vld [vmem:[#allocation16_spill] sm:$0xff] }
 0x206   :  { %5096 = vst [vmem:[#allocation34_spill] sm:$0xff] %v4045_v13  ;;  %2542 = vmatpush3.bf16.msra.mxu0 %v2691_v4 }
 0x207   :  { %v577_v13 = vmul.f32 %v5098_v12, %v545_v5  ;;  %v578_v15 = vmul.f32 %v5098_v12, %v546_v51  ;;  %v491_v7 = vpop.permute.xlu1 %490  ;;  %1216 = vrot.lane.b32.xlu1 %v5092_v47, %s2884_s13  ;;  %2570 = vmatpush3.bf16.msra.mxu1 %v2692_v33  ;;  %v2845_v33 = vld [vmem:[%s4878_s3 + $0x10] sm:$0xff] }
 0x208   :  { %v1341_v42 = vpop.permute.xlu0 %1340  ;;  %v496_v40 = vsel %vm492_vm3, %v3837_v0, %v491_v7  ;;  %v508_v45 = vsel %vm492_vm3, %v491_v7, %v3820_v8  ;;  %v456_v0 = vmul.f32 %v5097_v38, %v420_v22  ;;  %v459_v7 = vmul.f32 %v5097_v38, %v423_v62 }
 0x209   :  { %v593_v5 = vadd.f32 %v577_v13, %v457_v20  ;;  %v594_v51 = vadd.f32 %v578_v15, %v458_v63  ;;  %v4076_v11 = vsel %vm1356_vm8, %v1333_v17, %v1341_v42  ;;  %v544_v18 = vmul.f32 %v5090_v1, %v508_v45 }
 0x20a   :  { %5099 = vst [vmem:[#allocation70_spill] sm:$0xff] %v4076_v11  ;;  %v547_v29 = vmul.f32 %v5091_v60, %v496_v40  ;;  %v5128_v11 = vld [vmem:[#allocation51_spill] sm:$0xff] }
 0x20b   :  { %v576_v61 = vmul.f32 %v5098_v12, %v544_v18  ;;  %v611_v8 = vpop.permute.xlu1 %610  ;;  %1421 = vperm.xlu1 %2652, %v2845_v33  }
 0x20c   :  { %v579_v13 = vmul.f32 %v5098_v12, %v547_v29  ;;  %v4086_v17 = vpop.permute.xlu0 %1348  ;;  %v636_v34 = vsel %vm628_vm4, %v611_v8, %v3900_v16  ;;  %v640_v40 = vsel %vm628_vm4, %v3868_v6, %v611_v8  ;;  %v5102_v12 = vld [vmem:[#allocation19_spill] sm:$0xff] }
 0x20d   :  { %5100 = vst [vmem:[#allocation71_spill] sm:$0xff] %v4086_v17  ;;  %v592_v20 = vadd.f32 %v576_v61, %v456_v0  ;;  %v4097_v22 = vsel %vm1356_vm8, %v1341_v42, %v4086_v17  ;;  %v681_v38 = vmul.f32 %v3535_v23, %v640_v40  ;;  %v682_v63 = vmul.f32 %v3519_v52, %v636_v34 }
 0x20e   :  { %5101 = vst [vmem:[#allocation13_spill] sm:$0xff] %v4097_v22  ;;  %v595_v4 = vadd.f32 %v579_v13, %v459_v7 }
 0x20f   :  { %v713_v15 = vmul.f32 %v5102_v12, %v681_v38  ;;  %v627_v62 = vpop.permute.xlu1 %626  ;;  %v714_v61 = vmul.f32 %v5102_v12, %v682_v63  ;;  %1328 = vrot.lane.b32.xlu1 %v5081_v3, %s2886_s14 }
 0x210   :  { %v921_v45 = vpop.permute.xlu0 %920  ;;  %v632_v42 = vsel %vm628_vm4, %v3900_v16, %v627_v62  ;;  %v644_v18 = vsel %vm628_vm4, %v627_v62, %v3868_v6  ;;  %2654 = vset.pattern.permute.xlu1 %v5080_v50  ;;  %v5103_v62 = vld [vmem:[#allocation23_spill] sm:$0xff] }
 0x211   :  { %v729_v29 = vadd.f32 %v713_v15, %v593_v5  ;;  %v680_v0 = vmul.f32 %v3532_v53, %v644_v18  ;;  %v683_v8 = vmul.f32 %v3522_v30, %v632_v42  ;;  %v730_v7 = vadd.f32 %v714_v61, %v594_v51  ;;  %v5124_v50 = vld [vmem:[#allocation31_spill] sm:$0xff] }
 0x213   :  { %v712_v13 = vmul.f32 %v5102_v12, %v680_v0  ;;  %v715_v34 = vmul.f32 %v5102_v12, %v683_v8  ;;  %v747_v16 = vpop.permute.xlu1 %746  ;;  %1330 = vrot.lane.b32.xlu1 %v3283_v48, %s2886_s14 }
 0x214   :  { %v929_v40 = vpop.permute.xlu0 %928  ;;  %v772_v6 = vsel %vm764_vm5, %v747_v16, %v3952_v36  ;;  %v776_v5 = vsel %vm764_vm5, %v3926_v57, %v747_v16 }
 0x215   :  { %v728_v33 = vadd.f32 %v712_v13, %v592_v20  ;;  %v731_v38 = vadd.f32 %v715_v34, %v595_v4  ;;  %v959_v51 = vsel %vm948_vm6, %v921_v45, %v929_v40  ;;  %v817_v63 = vmul.f32 %v3599_v55, %v776_v5 }
 0x216   :  { %v4131_v12 = vmul.f32 %v3624_v35, %v959_v51  ;;  %v818_v15 = vmul.f32 %v3602_v28, %v772_v6 }
 0x217   :  { %v849_v61 = vmul.f32 %v5103_v62, %v817_v63  ;;  %v763_v42 = vpop.permute.xlu1 %762  ;;  %1338 = vrot.lane.b32.xlu1 %v3359_v56, %s2886_s14 }
 0x218   :  { %v850_v18 = vmul.f32 %v5103_v62, %v818_v15  ;;  %v937_v20 = vpop.permute.xlu0 %936  ;;  %v768_v4 = vsel %vm764_vm5, %v3952_v36, %v763_v42  ;;  %v780_v0 = vsel %vm764_vm5, %v763_v42, %v3926_v57  ;;  %v5111_v42 = vld [vmem:[#allocation7_spill] sm:$0xff] }
 0x219   :  { %v4142_v8 = vadd.f32 %v849_v61, %v729_v29  ;;  %v955_v13 = vsel %vm948_vm6, %v929_v40, %v937_v20  ;;  %v816_v34 = vmul.f32 %v3613_v43, %v780_v0  ;;  %v819_v16 = vmul.f32 %v3616_v46, %v768_v4  ;;  %v2458_v61 = vld [vmem:[%s4880_s5 + $0x7] ss:$8 sm:$0xf] }
 0x21a   :  { %v4150_v6 = vadd.f32 %v850_v18, %v730_v7  ;;  %v4153_v36 = vmul.f32 %v3635_v10, %v955_v13  ;;  %v1463_v7 = vld [vmem:[%s4879_s4 + $0x18] sm:$0xff]  ;;  %v5113_v18 = vld [vmem:[#allocation6_spill] sm:$0xff] }
 0x21b   :  { %5104 = vst [vmem:[#allocation14_spill] sm:$0xff] %v4142_v8  ;;  %v848_v5 = vmul.f32 %v5103_v62, %v816_v34  ;;  %v851_v57 = vmul.f32 %v5103_v62, %v819_v16  ;;  %1346 = vrot.lane.b32.xlu1 %v3297_v9, %s2886_s14  ;;  %v5109_v62 = vld [vmem:[#allocation12_spill] sm:$0xff]  ;;  %v5117_v13 = vld [vmem:[#allocation26_spill] sm:$0xff] }
 0x21c   :  { %5105 = vst [vmem:[#allocation24_spill] sm:$0xff] %v4150_v6  ;;  %v945_v29 = vpop.permute.xlu0 %944  ;;  %v5115_v4 = vld [vmem:[#allocation8_spill] sm:$0xff]  ;;  %v892_v34 = vmul.f32 %v5117_v13, %v5081_v3  ;;  %v893_v16 = vmul.f32 %v5117_v13, %v5082_v31  ;;  %v5121_v3 = vld [vmem:[#allocation35_spill] sm:$0xff]  ;;  %v5126_v6 = vld [vmem:[#allocation29_spill] sm:$0xff] }
 0x21d   :  { %v4157_v51 = vadd.f32 %v848_v5, %v728_v33  ;;  %v4159_v40 = vadd.f32 %v851_v57, %v731_v38  ;;  %v951_v63 = vsel %vm948_vm6, %v937_v20, %v945_v29  ;;  %v963_v15 = vsel %vm948_vm6, %v945_v29, %v921_v45  ;;  %v5108_v33 = vld [vmem:[#allocation5_spill] sm:$0xff]  ;;  %v4200_v29 = vpop.permute.xlu1 %1212 }
 0x21e   :  { %v4174_v38 = vmul.f32 %v5109_v62, %v5108_v33  ;;  %v4181_v45 = vmul.f32 %v5109_v62, %v5111_v42  ;;  %v4185_v20 = vmul.f32 %v5109_v62, %v5113_v18  ;;  %v4189_v0 = vmul.f32 %v5109_v62, %v5115_v4  ;;  %5118 = vst [vmem:[#allocation16_spill] sm:$0xff] %v4200_v29  ;;  %v5119_v33 = vld [vmem:[#allocation30_spill] sm:$0xff]  ;;  %v5120_v62 = vld [vmem:[#allocation32_spill] sm:$0xff]  ;;  %v5130_v29 = vld [vmem:[#allocation53_spill] sm:$0xff] }
 0x21f   :  { %5106 = vst [vmem:[#allocation61_spill] sm:$0xff] %v4157_v51  ;;  %5107 = vst [vmem:[#allocation62_spill] sm:$0xff] %v4159_v40  ;;  %1354 = vrot.lane.b32.xlu1 %v3370_v44, %s2886_s14  ;;  %v894_v5 = vmul.f32 %v5117_v13, %v5089_v41  ;;  %v895_v57 = vmul.f32 %v5117_v13, %v5092_v47  ;;  %v4206_v42 = vsel %vm628_vm4, %v5120_v62, %v5119_v33  ;;  %v5122_v47 = vld [vmem:[#allocation68_spill] sm:$0xff]  ;;  %v5123_v4 = vld [vmem:[#allocation38_spill] sm:$0xff] }
 0x220   :  { %5110 = vst [vmem:[#allocation37_spill] sm:$0xff] %v4174_v38  ;;  %5112 = vst [vmem:[#allocation18_spill] sm:$0xff] %v4181_v45  ;;  %v4212_v31 = vsel %vm628_vm4, %v5119_v33, %v5121_v3  ;;  %v4215_v41 = vrot.slane %v2458_v61, %v3428_v54  ;;  %v4218_v18 = vrot.slane %v2458_v61, %v5122_v47  ;;  %v5125_v40 = vld [vmem:[#allocation49_spill] sm:$0xff]  ;;  %v5127_v51 = vld [vmem:[#allocation66_spill] sm:$0xff] }
 0x221   :  { %5114 = vst [vmem:[#allocation22_spill] sm:$0xff] %v4185_v20  ;;  %5116 = vst [vmem:[#allocation15_spill] sm:$0xff] %v4189_v0  ;;  %v4227_v13 = vsel %vm628_vm4, %v5121_v3, %v5123_v4  ;;  %v374_v33 = vsel %vm369_vm2, %v5125_v40, %v5124_v50  ;;  %v378_v8 = vsel %vm369_vm2, %v5126_v6, %v5125_v40  ;;  %v5129_v3 = vld [vmem:[#allocation36_spill] sm:$0xff]  ;;  %v5131_v0 = vld [vmem:[#allocation33_spill] sm:$0xff] }
 0x222   :  { %v4238_v22 = vrot.slane %v2458_v61, %v5127_v51  ;;  %v382_v17 = vsel %vm369_vm2, %v5128_v11, %v5126_v6  ;;  %v497_v47 = vsel %vm492_vm3, %v5130_v29, %v5129_v3  ;;  %v501_v54 = vsel %vm492_vm3, %v5131_v0, %v5130_v29  ;;  %v5132_v20 = vld [vmem:[#allocation57_spill] sm:$0xff]  ;;  %v5133_v51 = vld [vmem:[#allocation54_spill] sm:$0xff]  ;;  %v5134_v38 = vld [vmem:[#allocation52_spill] sm:$0xff] }
 0x223   :  { %1481 = vperm.xlu1 %2654, %v1463_v7   ;;  %v2308_v7 = vld [vmem:[%s4886_s11] sm:$0xff]  ;;  %v4253_v40 = vrot.slane %v2458_v61, %v5132_v20  ;;  %v493_v45 = vsel %vm492_vm3, %v5129_v3, %v5133_v51  ;;  %v505_v6 = vsel %vm492_vm3, %v5133_v51, %v5131_v0  ;;  %v5135_v44 = vld [vmem:[#allocation75_spill] sm:$0xff]  ;;  %v5136_v29 = vld [vmem:[#allocation50_spill] sm:$0xff]  ;;  %v409_v3 = vmul.f32 %v3572_v2, %v378_v8 }
 0x224   :  { %v1226_v56 = vsel %vm1220_vm9, %v5135_v44, %v5134_v38  ;;  %v1230_v61 = vsel %vm1220_vm9, %v5136_v29, %v5135_v44  ;;  %v410_v10 = vmul.f32 %v3586_v19, %v374_v33  ;;  %v1222_v51 = vsel %vm1220_vm9, %v5134_v38, %v3983_v39 }
 0x225   :  { %v1234_v0 = vsel %vm1220_vm9, %v3983_v39, %v5136_v29  ;;  %v370_v44 = vsel %vm369_vm2, %v5124_v50, %v5128_v11  ;;  %v533_v2 = vmul.f32 %v5083_v49, %v501_v54  ;;  %v534_v19 = vmul.f32 %v5084_v59, %v497_v47  ;;  %v5138_v59 = vld [vmem:[#allocation74_spill] sm:$0xff] }
 0x226   :  { %v532_v8 = vmul.f32 %v5090_v1, %v505_v6  ;;  %v535_v38 = vmul.f32 %v5091_v60, %v493_v45  ;;  %v1264_v33 = vmul.f32 %v4215_v41, %v1230_v61  ;;  %v909_v39 = vadd.f32 %v893_v16, %v3969_v14 }
 0x227   :  { %2311 = vperm.xlu1 %2654, %v2308_v7   ;;  %v408_v7 = vmul.f32 %v3446_v21, %v382_v17  ;;  %v910_v29 = vadd.f32 %v894_v5, %v3971_v37  ;;  %v1266_v50 = vmul.f32 %v4238_v22, %v1222_v51  ;;  %v1267_v21 = vmul.f32 %v4253_v40, %v1234_v0 }
 0x228   :  { %v4273_v35 = vpop.permute.xlu1 %1413  ;;  %v908_v54 = vadd.f32 %v892_v34, %v3999_v32  ;;  %v911_v49 = vadd.f32 %v895_v57, %v4001_v24  ;;  %v998_v1 = vmul.f32 %v5138_v59, %v951_v63  ;;  %v999_v60 = vmul.f32 %v3647_v26, %v963_v15  ;;  %v5139_v63 = vld [vmem:[#allocation80_spill] sm:$0xff]  ;;  %v5140_v34 = vld [vmem:[#allocation81_spill] sm:$0xff] }
 0x229   :  { %v4271_v20 = vpop.permute.xlu0 %1149  ;;  %5137 = vst [vmem:[#allocation19_spill] sm:$0xff] %v4273_v35  ;;  %v1265_v35 = vmul.f32 %v4218_v18, %v1226_v56 }
 0x22d   :  { %v1014_v14 = vpop.permute.xlu1 %1013 }
 0x22e   :  { %v1282_v11 = vpop.permute.xlu0 %1281  ;;  %v1028_v37 = vmul.f32 %v1014_v14, %v4131_v12  ;;  %v1029_v16 = vmul.f32 %v1014_v14, %v4153_v36  ;;  %v1030_v5 = vmul.f32 %v1014_v14, %v998_v1  ;;  %v1031_v6 = vmul.f32 %v1014_v14, %v999_v60  ;;  %v5152_v14 = vld [vmem:[#allocation9_spill] sm:$0xff] }
 0x22f   :  { %v1296_v17 = vmul.f32 %v1282_v11, %v1264_v33  ;;  %v1297_v45 = vmul.f32 %v1282_v11, %v1265_v35  ;;  %v1298_v56 = vmul.f32 %v1282_v11, %v1266_v50  ;;  %v1299_v47 = vmul.f32 %v1282_v11, %v1267_v21  ;;  %v5144_v33 = vld [vmem:[#allocation59_spill] sm:$0xff] }
 0x230   :  { %v4318_v57 = vadd.f32 %v1028_v37, %v908_v54  ;;  %v1045_v61 = vadd.f32 %v1029_v16, %v909_v39  ;;  %v4320_v12 = vadd.f32 %v1030_v5, %v910_v29  ;;  %v4322_v36 = vadd.f32 %v1031_v6, %v911_v49  ;;  %v5145_v21 = vld [vmem:[#allocation11_spill] sm:$0xff] }
 0x231   :  { %v4307_v32 = vadd.f32 %v1296_v17, %v3785_v27  ;;  %v4310_v24 = vadd.f32 %v1297_v45, %v3771_v25  ;;  %v4313_v15 = vadd.f32 %v1298_v56, %v5139_v63  ;;  %v4316_v35 = vadd.f32 %v1299_v47, %v5140_v34  ;;  %v5143_v27 = vld [vmem:[#allocation28_spill] sm:$0xff]  ;;  %v4336_v39 = vpop.permute.xlu1 %1017  ;;  %v5151_v56 = vld [vmem:[#allocation77_spill] sm:$0xff] }
 0x232   :  { %5141 = vst [vmem:[#allocation23_spill] sm:$0xff] %v4318_v57  ;;  %5142 = vst [vmem:[#allocation5_spill] sm:$0xff] %v4322_v36  ;;  %v4324_v51 = vpop.permute.xlu0 %1064  ;;  %v4328_v0 = vmul.f32 %v5143_v27, %v3283_v48  ;;  %v637_v25 = vsel %vm628_vm4, %v5123_v4, %v5120_v62  ;;  %v411_v50 = vmul.f32 %v5144_v33, %v370_v44  ;;  %v5146_v4 = vld [vmem:[#allocation10_spill] sm:$0xff]  ;;  %v5148_v17 = vld [vmem:[#allocation60_spill] sm:$0xff] }
 0x233   :  { %v565_v54 = vmul.f32 %v5145_v21, %v533_v2  ;;  %v4340_v29 = vmul.f32 %v5143_v27, %v3297_v9  ;;  %v670_v49 = vmul.f32 %v3519_v52, %v4206_v42  ;;  %v671_v48 = vmul.f32 %v3522_v30, %v4212_v31  ;;  %v5147_v42 = vld [vmem:[#allocation39_spill] sm:$0xff] }
 0x234   :  { %v566_v1 = vmul.f32 %v5145_v21, %v534_v19  ;;  %v668_v62 = vmul.f32 %v3532_v53, %v4227_v13  ;;  %v445_v44 = vmul.f32 %v5146_v4, %v409_v3  ;;  %v564_v2 = vmul.f32 %v5145_v21, %v532_v8  ;;  %v5149_v3 = vld [vmem:[#allocation56_spill] sm:$0xff] }
 0x235   :  { %v567_v60 = vmul.f32 %v5145_v21, %v535_v38  ;;  %v669_v9 = vmul.f32 %v3535_v23, %v637_v25  ;;  %v446_v11 = vmul.f32 %v5146_v4, %v410_v10  ;;  %v444_v52 = vmul.f32 %v5146_v4, %v408_v7  ;;  %v4367_v10 = vpop.permute.xlu1 %1326  ;;  %v5150_v8 = vld [vmem:[#allocation40_spill] sm:$0xff] }
 0x236   :  { %v777_v30 = vsel %vm764_vm5, %v5148_v17, %v5147_v42  ;;  %v1073_v31 = vpop.permute.xlu0 %1072  ;;  %v447_v53 = vmul.f32 %v5146_v4, %v411_v50  ;;  %v581_v13 = vadd.f32 %v565_v54, %v445_v44  ;;  %v773_v19 = vsel %vm764_vm5, %v5147_v42, %v5149_v3 }
 0x237   :  { %v1091_v23 = vsel %vm1084_vm7, %v4324_v51, %v1073_v31  ;;  %v582_v7 = vadd.f32 %v566_v1, %v446_v11  ;;  %v769_v38 = vsel %vm764_vm5, %v5149_v3, %v5150_v8  ;;  %v765_v45 = vsel %vm764_vm5, %v5150_v8, %v5148_v17  ;;  %v5155_v11 = vld [vmem:[#allocation20_spill] sm:$0xff]  ;;  %v5158_v17 = vld [vmem:[#allocation41_spill] sm:$0xff] }
 0x238   :  { %v1133_v47 = vmul.f32 %v5151_v56, %v1091_v23  ;;  %v702_v37 = vmul.f32 %v5152_v14, %v670_v49  ;;  %v580_v16 = vadd.f32 %v564_v2, %v444_v52  ;;  %v583_v5 = vadd.f32 %v567_v60, %v447_v53  ;;  %v5156_v52 = vld [vmem:[#allocation42_spill] sm:$0xff]  ;;  %v5162_v8 = vld [vmem:[#allocation65_spill] sm:$0xff] }
 0x239   :  { %v804_v6 = vmul.f32 %v3613_v43, %v777_v30  ;;  %v703_v63 = vmul.f32 %v5152_v14, %v671_v48  ;;  %v701_v34 = vmul.f32 %v5152_v14, %v669_v9  ;;  %v805_v25 = vmul.f32 %v3599_v55, %v773_v19  ;;  %v4392_v1 = vpop.permute.xlu1 %1334  ;;  %v5154_v55 = vld [vmem:[#allocation78_spill] sm:$0xff] }
 0x23a   :  { %v1165_v33 = vmul.f32 %v4271_v20, %v1133_v47  ;;  %v4384_v50 = vpop.permute.xlu0 %1080  ;;  %v700_v21 = vmul.f32 %v5152_v14, %v668_v62  ;;  %v806_v54 = vmul.f32 %v3602_v28, %v769_v38  ;;  %v807_v49 = vmul.f32 %v3616_v46, %v765_v45  ;;  %v5157_v28 = vld [vmem:[#allocation63_spill] sm:$0xff]  ;;  %v5163_v47 = vld [vmem:[#allocation73_spill] sm:$0xff] }
 0x23b   :  { %v1087_v43 = vsel %vm1084_vm7, %v1073_v31, %v4384_v50  ;;  %v717_v48 = vadd.f32 %v701_v34, %v581_v13  ;;  %v718_v4 = vadd.f32 %v702_v37, %v582_v7  ;;  %v719_v9 = vadd.f32 %v703_v63, %v583_v5  ;;  %v5161_v7 = vld [vmem:[#allocation45_spill] sm:$0xff]  ;;  %v5164_v37 = vld [vmem:[#allocation43_spill] sm:$0xff] }
 0x23c   :  { %v4394_v44 = vadd.f32 %v1165_v33, %v1045_v61  ;;  %v1134_v2 = vmul.f32 %v5154_v55, %v1087_v43  ;;  %v716_v60 = vadd.f32 %v700_v21, %v580_v16  ;;  %v836_v62 = vmul.f32 %v5155_v11, %v804_v6  ;;  %v5159_v61 = vld [vmem:[#allocation64_spill] sm:$0xff]  ;;  %v5165_v5 = vld [vmem:[#allocation67_spill] sm:$0xff] }
 0x23d   :  { %v953_v46 = vsel %vm948_vm6, %v5157_v28, %v5156_v52  ;;  %v837_v42 = vmul.f32 %v5155_v11, %v805_v25  ;;  %v957_v30 = vsel %vm948_vm6, %v5158_v17, %v5157_v28  ;;  %v949_v31 = vsel %vm948_vm6, %v5156_v52, %v5159_v61  ;;  %v4424_v45 = vpop.permute.xlu1 %1342  ;;  %v5167_v25 = vld [vmem:[#allocation72_spill] sm:$0xff]  ;;  %v5169_v52 = vld [vmem:[#allocation47_spill] sm:$0xff] }
 0x23e   :  { %5153 = vst [vmem:[#allocation12_spill] sm:$0xff] %v4394_v44  ;;  %v1166_v53 = vmul.f32 %v4271_v20, %v1134_v2  ;;  %v4412_v13 = vpop.permute.xlu0 %1285  ;;  %v838_v3 = vmul.f32 %v5155_v11, %v806_v54  ;;  %v839_v19 = vmul.f32 %v5155_v11, %v807_v49  ;;  %v961_v23 = vsel %vm948_vm6, %v5159_v61, %v5158_v17  ;;  %v5168_v11 = vld [vmem:[#allocation69_spill] sm:$0xff] }
 0x23f   :  { %5160 = vst [vmem:[#allocation7_spill] sm:$0xff] %v4412_v13  ;;  %v1089_v38 = vsel %vm1084_vm7, %v5162_v8, %v5161_v7  ;;  %v989_v14 = vmul.f32 %v5163_v47, %v953_v46  ;;  %v1093_v16 = vsel %vm1084_vm7, %v5164_v37, %v5162_v8  ;;  %v1085_v6 = vsel %vm1084_vm7, %v5161_v7, %v5165_v5  ;;  %v5171_v46 = vld [vmem:[#allocation76_spill] sm:$0xff]  ;;  %v5174_v8 = vld [vmem:[#allocation79_spill] sm:$0xff] }
 0x240   :  { %v4436_v63 = vadd.f32 %v1166_v53, %v4320_v12  ;;  %v852_v34 = vadd.f32 %v836_v62, %v716_v60  ;;  %v988_v33 = vmul.f32 %v5167_v25, %v957_v30  ;;  %v990_v21 = vmul.f32 %v5138_v59, %v949_v31  ;;  %v5170_v60 = vld [vmem:[#allocation44_spill] sm:$0xff] }
 0x241   :  { %v1097_v54 = vsel %vm1084_vm7, %v5165_v5, %v5164_v37  ;;  %v853_v49 = vadd.f32 %v837_v42, %v717_v48  ;;  %v991_v43 = vmul.f32 %v3647_v26, %v961_v23  ;;  %v1125_v2 = vmul.f32 %v5151_v56, %v1089_v38  ;;  %v4456_v61 = vpop.permute.xlu1 %1350  ;;  %v5172_v42 = vld [vmem:[#allocation46_spill] sm:$0xff]  ;;  %v5173_v23 = vld [vmem:[#allocation17_spill] sm:$0xff]  ;;  %v5182_v13 = vld [vmem:[#allocation68_spill] sm:$0xff] }
 0x242   :  { %5166 = vst [vmem:[#allocation6_spill] sm:$0xff] %v4436_v63  ;;  %v1229_v12 = vsel %vm1220_vm9, %v5169_v52, %v5168_v11  ;;  %v4452_v62 = vmul.f32 %v5143_v27, %v5170_v60  ;;  %v854_v28 = vadd.f32 %v838_v3, %v718_v4  ;;  %v1124_v17 = vmul.f32 %v5171_v46, %v1093_v16  ;;  %v2459_v4 = vld [vmem:[%s4880_s5 + $0x20] ss:$8 sm:$0xf] }
 0x243   :  { %v1126_v30 = vmul.f32 %v5154_v55, %v1085_v6  ;;  %v4458_v48 = vpop.permute.xlu0 %1417  ;;  %v4462_v31 = vmul.f32 %v5143_v27, %v5172_v42  ;;  %v855_v53 = vadd.f32 %v839_v19, %v719_v9  ;;  %v1021_v7 = vmul.f32 %v5173_v23, %v989_v14  ;;  %v5175_v3 = vld [vmem:[#allocation37_spill] sm:$0xff]  ;;  %v5176_v60 = vld [vmem:[#allocation18_spill] sm:$0xff]  ;;  %v5178_v42 = vld [vmem:[#allocation48_spill] sm:$0xff] }
 0x244   :  { %v1127_v38 = vmul.f32 %v5174_v8, %v1097_v54  ;;  %v900_v37 = vadd.f32 %v5175_v3, %v852_v34  ;;  %v1020_v16 = vmul.f32 %v5173_v23, %v988_v33  ;;  %v1022_v5 = vmul.f32 %v5173_v23, %v990_v21  ;;  %v5177_v19 = vld [vmem:[#allocation21_spill] sm:$0xff]  ;;  %v5179_v63 = vld [vmem:[#allocation22_spill] sm:$0xff] }
 0x245   :  { %v1260_v6 = vmul.f32 %v4215_v41, %v1229_v12  ;;  %v901_v27 = vadd.f32 %v5176_v60, %v853_v49  ;;  %v1023_v9 = vmul.f32 %v5173_v23, %v991_v43  ;;  %v1157_v14 = vmul.f32 %v5177_v19, %v1125_v2  ;;  %v5180_v21 = vld [vmem:[#allocation58_spill] sm:$0xff]  ;;  %v923_v12 = vpop.permute.xlu1 %922  ;;  %v5181_v43 = vld [vmem:[#allocation15_spill] sm:$0xff] }
 0x246   :  { %v1225_v54 = vsel %vm1220_vm9, %v5168_v11, %v5178_v42  ;;  %v902_v44 = vadd.f32 %v5179_v63, %v854_v28  ;;  %v1156_v34 = vmul.f32 %v5177_v19, %v1124_v17  ;;  %v1158_v33 = vmul.f32 %v5177_v19, %v1126_v30  ;;  %v5183_v28 = vld [vmem:[#allocation25_spill] sm:$0xff] }
 0x247   :  { %v4484_v3 = vrot.slane %v2459_v4, %v5180_v21  ;;  %v1195_v49 = vpop.permute.xlu0 %1194  ;;  %v1037_v60 = vadd.f32 %v1021_v7, %v901_v27  ;;  %v903_v23 = vadd.f32 %v5181_v43, %v855_v53  ;;  %v1159_v2 = vmul.f32 %v5177_v19, %v1127_v38  ;;  %v5184_v21 = vld [vmem:[#allocation66_spill] sm:$0xff]  ;;  %v5185_v7 = vld [vmem:[#allocation57_spill] sm:$0xff]  ;;  %v5188_v19 = vld [vmem:[#allocation71_spill] sm:$0xff] }
 0x248   :  { %v4489_v55 = vrot.slane %v2459_v4, %v5182_v13  ;;  %v1036_v11 = vadd.f32 %v1020_v16, %v900_v37  ;;  %v1038_v56 = vadd.f32 %v1022_v5, %v902_v44  ;;  %v1261_v63 = vmul.f32 %v4218_v18, %v1225_v54  ;;  %v5186_v13 = vld [vmem:[#allocation16_spill] sm:$0xff]  ;;  %v5190_v43 = vld [vmem:[#allocation70_spill] sm:$0xff] }
 0x249   :  { %v1292_v17 = vmul.f32 %v5183_v28, %v1260_v6  ;;  %v1039_v30 = vadd.f32 %v1023_v9, %v903_v23  ;;  %v4493_v36 = vadd.f32 %v1157_v14, %v1037_v60  ;;  %v4496_v57 = vrot.slane %v2459_v4, %v5184_v21  ;;  %v931_v16 = vpop.permute.xlu1 %930  ;;  %v5187_v9 = vld [vmem:[#allocation27_spill] sm:$0xff] }
 0x24a   :  { %v4499_v27 = vrot.slane %v2459_v4, %v5185_v7  ;;  %v1172_v53 = vadd.f32 %v1156_v34, %v1036_v11  ;;  %v4501_v38 = vadd.f32 %v1158_v33, %v1038_v56  ;;  %v1221_v44 = vsel %vm1220_vm9, %v5178_v42, %v5186_v13  ;;  %v5189_v33 = vld [vmem:[#allocation34_spill] sm:$0xff] }
 0x24b   :  { %v1233_v37 = vsel %vm1220_vm9, %v5186_v13, %v5169_v52  ;;  %v1203_v5 = vpop.permute.xlu0 %1202  ;;  %v1175_v6 = vadd.f32 %v1159_v2, %v1039_v30  ;;  %v1369_v4 = vsel %vm1356_vm8, %v5188_v19, %v5187_v9  ;;  %v960_v56 = vsel %vm948_vm6, %v923_v12, %v931_v16  ;;  %v5191_v30 = vld [vmem:[#allocation13_spill] sm:$0xff] }
 0x24c   :  { %v1232_v14 = vsel %vm1220_vm9, %v1195_v49, %v1203_v5  ;;  %v1293_v42 = vmul.f32 %v5183_v28, %v1261_v63  ;;  %v1308_v54 = vadd.f32 %v1292_v17, %v1172_v53  ;;  %v1000_v34 = vmul.f32 %v5167_v25, %v960_v56  ;;  %v5192_v17 = vld [vmem:[#allocation61_spill] sm:$0xff] }
 0x24d   :  { %v4522_v52 = vmul.f32 %v4215_v41, %v1232_v14  ;;  %v1396_v60 = vmul.f32 %v4484_v3, %v5189_v33  ;;  %v1397_v23 = vmul.f32 %v4489_v55, %v5190_v43  ;;  %v1262_v2 = vmul.f32 %v4238_v22, %v1221_v44  ;;  %v939_v53 = vpop.permute.xlu1 %938  ;;  %v5193_v44 = vld [vmem:[#allocation14_spill] sm:$0xff] }
 0x24e   :  { %v1263_v11 = vmul.f32 %v4253_v40, %v1233_v37  ;;  %v1398_v21 = vmul.f32 %v4496_v57, %v5191_v30  ;;  %v1399_v63 = vmul.f32 %v4499_v27, %v1369_v4  ;;  %v912_v25 = vadd.f32 %v4328_v0, %v5192_v17 }
 0x24f   :  { %v1032_v7 = vmul.f32 %v4336_v39, %v1000_v34  ;;  %v1211_v13 = vpop.permute.xlu0 %1210  ;;  %v1358_v9 = vsel %vm1356_vm8, %v4424_v45, %v4456_v61  ;;  %v913_v37 = vadd.f32 %v4452_v62, %v5193_v44  ;;  %v956_v19 = vsel %vm948_vm6, %v931_v16, %v939_v53  ;;  %v5194_v34 = vld [vmem:[#allocation24_spill] sm:$0xff] }
 0x250   :  { %v1228_v4 = vsel %vm1220_vm9, %v1203_v5, %v1211_v13  ;;  %v1001_v0 = vmul.f32 %v5163_v47, %v956_v19  ;;  %v914_v33 = vadd.f32 %v4340_v29, %v5194_v34  ;;  %v1294_v43 = vmul.f32 %v5183_v28, %v1262_v2  ;;  %v5195_v5 = vld [vmem:[#allocation62_spill] sm:$0xff] }
 0x251   :  { %v4546_v56 = vadd.f32 %v1032_v7, %v912_v25  ;;  %v4550_v14 = vmul.f32 %v4218_v18, %v1228_v4  ;;  %v1295_v62 = vmul.f32 %v5183_v28, %v1263_v11  ;;  %v1366_v16 = vsel %vm1356_vm8, %v4367_v10, %v4392_v1  ;;  %v947_v11 = vpop.permute.xlu1 %946 }
 0x252   :  { %v915_v30 = vadd.f32 %v4462_v31, %v5195_v5  ;;  %v1362_v47 = vsel %vm1356_vm8, %v4392_v1, %v4424_v45  ;;  %v1370_v29 = vsel %vm1356_vm8, %v4456_v61, %v4367_v10  ;;  %v1402_v28 = vmul.f32 %v4496_v57, %v1358_v9  ;;  %v5196_v10 = vld [vmem:[#allocation19_spill] sm:$0xff] }
 0x253   :  { %v1033_v2 = vmul.f32 %v4336_v39, %v1001_v0  ;;  %v1219_v17 = vpop.permute.xlu0 %1218  ;;  %v952_v25 = vsel %vm948_vm6, %v939_v53, %v947_v11  ;;  %v964_v31 = vsel %vm948_vm6, %v947_v11, %v923_v12  ;;  %v1428_v61 = vmul.f32 %v5196_v10, %v1396_v60 }
 0x254   :  { %v4578_v1 = vsel %vm1220_vm9, %v1211_v13, %v1219_v17  ;;  %v4582_v45 = vsel %vm1220_vm9, %v1219_v17, %v1195_v49  ;;  %v1002_v9 = vmul.f32 %v5138_v59, %v952_v25  ;;  %v1003_v44 = vmul.f32 %v3647_v26, %v964_v31 }
 0x255   :  { %v4585_v7 = vadd.f32 %v1033_v2, %v913_v37  ;;  %v1429_v53 = vmul.f32 %v5196_v10, %v1397_v23  ;;  %v1400_v12 = vmul.f32 %v4484_v3, %v1366_v16  ;;  %v1401_v19 = vmul.f32 %v4489_v55, %v1362_v47  ;;  %v4597_v0 = vpop.permute.xlu1 %1153 }
 0x256   :  { %v1403_v13 = vmul.f32 %v4499_v27, %v1370_v29  ;;  %v1430_v4 = vmul.f32 %v5196_v10, %v1398_v21  ;;  %v1431_v49 = vmul.f32 %v5196_v10, %v1399_v63  ;;  %v1034_v60 = vmul.f32 %v4336_v39, %v1002_v9 }
 0x257   :  { %v1035_v37 = vmul.f32 %v4336_v39, %v1003_v44  ;;  %v4599_v59 = vpop.permute.xlu0 %1425  ;;  %v1309_v26 = vadd.f32 %v1293_v42, %v4493_v36  ;;  %v1432_v23 = vmul.f32 %v4458_v48, %v1400_v12  ;;  %v1433_v34 = vmul.f32 %v4458_v48, %v1401_v19 }
 0x258   :  { %v1434_v16 = vmul.f32 %v4458_v48, %v1402_v28  ;;  %v1310_v21 = vadd.f32 %v1294_v43, %v4501_v38  ;;  %v1311_v5 = vadd.f32 %v1295_v62, %v1175_v6  ;;  %v4606_v63 = vadd.f32 %v1034_v60, %v914_v33 }
 0x259   :  { %v4608_v47 = vadd.f32 %v1035_v37, %v915_v30  ;;  %v1435_v39 = vmul.f32 %v4458_v48, %v1403_v13  ;;  %v1445_v29 = vadd.f32 %v1429_v53, %v1309_v26  ;;  %v1444_v17 = vadd.f32 %v1428_v61, %v1308_v54  ;;  %v5197_v26 = vld [vmem:[#allocation23_spill] sm:$0xff] }
 0x25a   :  { %v1446_v2 = vadd.f32 %v1430_v4, %v1310_v21  ;;  %v1447_v11 = vadd.f32 %v1431_v49, %v1311_v5  ;;  %v1467_v36 = vpop.permute.xlu1 %1466  ;;  %v1448_v25 = vadd.f32 %v1432_v23, %v4307_v32  ;;  %v1449_v31 = vadd.f32 %v1433_v34, %v4310_v24 }
 0x25b   :  { %v1450_v28 = vadd.f32 %v1434_v16, %v4313_v15  ;;  %v4614_v38 = vadd.f32 %v1467_v36, %v1444_v17  ;;  %v4616_v6 = vadd.f32 %v1467_v36, %v1445_v29  ;;  %v1451_v48 = vadd.f32 %v1435_v39, %v4316_v35  ;;  %v5199_v17 = vld [vmem:[#allocation77_spill] sm:$0xff] }
 0x25c   :  { %v1472_v42 = vpop.permute.xlu0 %1471  ;;  %v4618_v33 = vadd.f32 %v1467_v36, %v1446_v2  ;;  %v4620_v43 = vadd.f32 %v1467_v36, %v1447_v11 }
 0x25d   :  { %v4623_v62 = vadd.f32 %v1472_v42, %v1448_v25  ;;  %v4625_v54 = vadd.f32 %v1472_v42, %v1449_v31  ;;  %v2460_v32 = vmul.f32 -1.442695, %v4614_v38  ;;  %v2461_v24 = vmul.f32 -1.442695, %v4616_v6 }
 0x25e   :  { %v2462_v15 = vmul.f32 -1.442695, %v4618_v33  ;;  %v4630_v30 = vadd.f32 %v1472_v42, %v1450_v28  ;;  %v2463_v10 = vmul.f32 -1.442695, %v4620_v43  ;;  %v4633_v61 = vadd.f32 %v1472_v42, %v1451_v48  ;;  %v1057_v9 = vpop.permute.xlu1 %1056 }
 0x25f   :  { %2759 = vpow2.f32 %v2460_v32  ;;  %v2464_v35 = vmul.f32 -1.442695, %v4623_v62  ;;  %v1095_v44 = vsel %vm1084_vm7, %v1057_v9, %v4324_v51  ;;  %v2465_v53 = vmul.f32 -1.442695, %v4625_v54 }
 0x260   :  { %2761 = vpow2.f32 %v2461_v24  ;;  %v1099_v12 = vsel %vm1084_vm7, %v4384_v50, %v1057_v9  ;;  %v1132_v19 = vmul.f32 %v5171_v46, %v1095_v44  ;;  %v2466_v13 = vmul.f32 -1.442695, %v4630_v30  ;;  %v5198_v50 = vld [vmem:[#allocation5_spill] sm:$0xff]  ;;  %v5200_v44 = vld [vmem:[#allocation78_spill] sm:$0xff] }
 0x261   :  { %2763 = vpow2.f32 %v2462_v15  ;;  %v1135_v4 = vmul.f32 %v5174_v8, %v1099_v12  ;;  %v2467_v49 = vmul.f32 -1.442695, %v4633_v61 }
 0x262   :  { %2765 = vpow2.f32 %v2463_v10  ;;  %v1164_v60 = vmul.f32 %v4271_v20, %v1132_v19  ;;  %v1059_v51 = vpop.permute.xlu1 %1058  ;;  %v1274_v19 = vmul.f32 %v4238_v22, %v4578_v1 }
 0x263   :  { %2767 = vpow2.f32 %v2464_v35  ;;  %v1167_v37 = vmul.f32 %v4271_v20, %v1135_v4 }
 0x264   :  { %2769 = vpow2.f32 %v2465_v53  ;;  %v4650_v23 = vadd.f32 %v1164_v60, %v5197_v26  ;;  %v1275_v60 = vmul.f32 %v4253_v40, %v4582_v45 }
 0x265   :  { %2771 = vpow2.f32 %v2466_v13  ;;  %v4653_v34 = vadd.f32 %v1167_v37, %v5198_v50 }
 0x266   :  { %2773 = vpow2.f32 %v2467_v49  ;;  %v1067_v16 = vpop.permute.xlu1 %1066 }
 0x267   :  { %v1096_v21 = vsel %vm1084_vm7, %v1059_v51, %v1067_v16 }
 0x268   :  { %v1136_v5 = vmul.f32 %v5171_v46, %v1096_v21 }
 0x26a   :  { %v1168_v39 = vmul.f32 %v4597_v0, %v1136_v5  ;;  %v1075_v29 = vpop.permute.xlu1 %1074 }
 0x26b   :  { %v1092_v20 = vsel %vm1084_vm7, %v1067_v16, %v1075_v29 }
 0x26c   :  { %v2760_v2 = vpop.eup %2759  ;;  %v1184_v11 = vadd.f32 %v1168_v39, %v4546_v56  ;;  %v1137_v36 = vmul.f32 %v5199_v17, %v1092_v20 }
 0x26d   :  { %v2762_v42 = vpop.eup %2761  ;;  %v1548_v25 = vadd.f32 1.0, %v2760_v2 }
 0x26e   :  { %v2764_v31 = vpop.eup %2763  ;;  %v1549_v28 = vadd.f32 1.0, %v2762_v42  ;;  %v1169_v48 = vmul.f32 %v4597_v0, %v1137_v36  ;;  %v1083_v32 = vpop.permute.xlu1 %1082 }
 0x26f   :  { %v2766_v24 = vpop.eup %2765  ;;  %v1550_v46 = vadd.f32 1.0, %v2764_v31  ;;  %2775 = vrcp.f32 %v1548_v25  ;;  %v1088_v15 = vsel %vm1084_vm7, %v1075_v29, %v1083_v32  ;;  %v1100_v10 = vsel %vm1084_vm7, %v1083_v32, %v1059_v51  ;;  %v1337_v36 = vpop.permute.xlu0 %1336 }
 0x270   :  { %v2768_v9 = vpop.eup %2767  ;;  %v1551_v56 = vadd.f32 1.0, %v2766_v24  ;;  %2777 = vrcp.f32 %v1549_v28  ;;  %v1185_v35 = vadd.f32 %v1169_v48, %v4585_v7  ;;  %v1138_v53 = vmul.f32 %v5200_v44, %v1088_v15  ;;  %v5201_v28 = vld [vmem:[#allocation7_spill] sm:$0xff] }
 0x271   :  { %v2770_v12 = vpop.eup %2769  ;;  %2779 = vrcp.f32 %v1550_v46  ;;  %v1552_v13 = vadd.f32 1.0, %v2768_v9  ;;  %v1139_v4 = vmul.f32 %v5174_v8, %v1100_v10 }
 0x272   :  { %v2772_v49 = vpop.eup %2771  ;;  %2781 = vrcp.f32 %v1551_v56  ;;  %v1553_v51 = vadd.f32 1.0, %v2770_v12  ;;  %v1170_v37 = vmul.f32 %v4597_v0, %v1138_v53  ;;  %v1290_v26 = vpop.permute.xlu1 %1289 }
 0x273   :  { %v2774_v7 = vpop.eup %2773  ;;  %v1554_v50 = vadd.f32 1.0, %v2772_v49  ;;  %2783 = vrcp.f32 %v1552_v13  ;;  %v1171_v16 = vmul.f32 %v4597_v0, %v1139_v4  ;;  %v1304_v1 = vmul.f32 %v1290_v26, %v4522_v52  ;;  %v1345_v46 = vpop.permute.xlu0 %1344  ;;  %v5202_v49 = vld [vmem:[#allocation12_spill] sm:$0xff] }
 0x274   :  { %v1555_v21 = vadd.f32 1.0, %v2774_v7  ;;  %2785 = vrcp.f32 %v1553_v51  ;;  %v1186_v8 = vadd.f32 %v1170_v37, %v4606_v63  ;;  %v1305_v5 = vmul.f32 %v1290_v26, %v4550_v14 }
 0x275   :  { %2787 = vrcp.f32 %v1554_v50  ;;  %v1187_v45 = vadd.f32 %v1171_v16, %v4608_v47  ;;  %v1306_v39 = vmul.f32 %v1290_v26, %v1274_v19  ;;  %v1307_v29 = vmul.f32 %v1290_v26, %v1275_v60 }
 0x276   :  { %2789 = vrcp.f32 %v1555_v21  ;;  %v4681_v20 = vadd.f32 %v1304_v1, %v1184_v11  ;;  %v4683_v2 = vadd.f32 %v1305_v5, %v1185_v35  ;;  %v1193_v17 = vpop.permute.xlu1 %1192  ;;  %v1363_v12 = vsel %vm1356_vm8, %v1337_v36, %v1345_v46 }
 0x277   :  { %v4685_v0 = vadd.f32 %v1306_v39, %v1186_v8  ;;  %v4687_v52 = vadd.f32 %v1307_v29, %v1187_v45  ;;  %v1353_v37 = vpop.permute.xlu0 %1352 }
 0x278   :  { %v1359_v1 = vsel %vm1356_vm8, %v1345_v46, %v1353_v37 }
 0x279   :  { %v1406_v29 = vmul.f32 %v4496_v57, %v1359_v1 }
 0x27a   :  { %v1201_v42 = vpop.permute.xlu1 %1200 }
 0x27b   :  { %v1231_v14 = vsel %vm1220_vm9, %v1193_v17, %v1201_v42 }
 0x27c   :  { %v2776_v63 = vpop.eup %2775  ;;  %v1268_v47 = vmul.f32 %v4215_v41, %v1231_v14  ;;  %v5203_v14 = vld [vmem:[#allocation6_spill] sm:$0xff] }
 0x27d   :  { %v2778_v25 = vpop.eup %2777  ;;  %v4694_v24 = vmul.f32 %v2776_v63, %v4614_v38 }
 0x27e   :  { %v2780_v31 = vpop.eup %2779  ;;  %v1300_v11 = vmul.f32 %v5201_v28, %v1268_v47  ;;  %v1209_v48 = vpop.permute.xlu1 %1208  ;;  %v4701_v41 = vmul.f32 %v2778_v25, %v4616_v6 }
 0x27f   :  { %v2782_v32 = vpop.eup %2781  ;;  %v1227_v15 = vsel %vm1220_vm9, %v1201_v42, %v1209_v48  ;;  %v4704_v44 = vmul.f32 %v2780_v31, %v4618_v33 }
 0x280   :  { %v2784_v10 = vpop.eup %2783  ;;  %v1316_v9 = vadd.f32 %v1300_v11, %v4650_v23  ;;  %v1269_v56 = vmul.f32 %v4218_v18, %v1227_v15  ;;  %v4716_v18 = vmul.f32 %v2782_v32, %v4620_v43 }
 0x281   :  { %v2786_v35 = vpop.eup %2785  ;;  %v4707_v53 = vmul.f32 %v2784_v10, %v4623_v62 }
 0x282   :  { %v2788_v38 = vpop.eup %2787  ;;  %v1301_v19 = vmul.f32 %v5201_v28, %v1269_v56  ;;  %v4713_v23 = vmul.f32 %v2786_v35, %v4625_v54  ;;  %v1217_v6 = vpop.permute.xlu1 %1216 }
 0x283   :  { %v2790_v13 = vpop.eup %2789  ;;  %v4719_v33 = vmul.f32 %v2788_v38, %v4630_v30  ;;  %v1612_v62 = vpack.c.bf16 %v4707_v53, %v4694_v24  ;;  %v1223_v4 = vsel %vm1220_vm9, %v1209_v48, %v1217_v6  ;;  %v1405_v30 = vmul.f32 %v4489_v55, %v1363_v12  ;;  %v1477_v48 = vpop.permute.xlu0 %1476 }
 0x284   :  { %v1317_v60 = vadd.f32 %v1301_v19, %v5202_v49  ;;  %v1613_v54 = vpack.c.bf16 %v4713_v23, %v4701_v41  ;;  %v4729_v51 = vmul.f32 %v2790_v13, %v4633_v61  ;;  %v1270_v7 = vmul.f32 %v4238_v22, %v1223_v4 }
 0x285   :  { %v1614_v43 = vpack.c.bf16 %v4719_v33, %v4704_v44  ;;  %v1235_v61 = vsel %vm1220_vm9, %v1217_v6, %v1193_v17 }
 0x286   :  { %1908 = vmatprep.mubr.bf16.mxu0 %v1613_v54  ;;  %v1615_v26 = vpack.c.bf16 %v4729_v51, %v4716_v18  ;;  %v1422_v50 = vpop.permute.xlu1 %1421  ;;  %v1302_v8 = vmul.f32 %v5201_v28, %v1270_v7  ;;  %v1271_v45 = vmul.f32 %v4253_v40, %v1235_v61 }
 0x287   :  { %1909 = vmatmul.mubr.bf16.vlgmr.msra.gmra.mxu0 %v1612_v62  ;;  %v1437_v16 = vmul.f32 %v1422_v50, %v1405_v30  ;;  %v1438_v47 = vmul.f32 %v1422_v50, %v1406_v29 }
 0x288   :  { %1957 = vmatprep.mubr.bf16.mxu1 %v1615_v26  ;;  %v1318_v63 = vadd.f32 %v1302_v8, %v5203_v14  ;;  %v1303_v11 = vmul.f32 %v5201_v28, %v1271_v45 }
 0x289   :  { %1958 = vmatmul.mubr.bf16.vlgmr.msra.gmra.mxu1 %v1614_v43  ;;  %v1453_v21 = vadd.f32 %v1437_v16, %v1317_v60 }
 0x28a   :  { %v1329_v5 = vpop.permute.xlu1 %1328  ;;  %v1319_v15 = vadd.f32 %v1303_v11, %v4653_v34 }
 0x28b   :  { %v1367_v22 = vsel %vm1356_vm8, %v1329_v5, %v1337_v36  ;;  %v1371_v39 = vsel %vm1356_vm8, %v1353_v37, %v1329_v5  ;;  %v1454_v36 = vadd.f32 %v1438_v47, %v1318_v63  ;;  %v4755_v56 = vadd.f32 %v1477_v48, %v1453_v21 }
 0x28c   :  { %v1404_v17 = vmul.f32 %v4484_v3, %v1367_v22  ;;  %v1407_v42 = vmul.f32 %v4499_v27, %v1371_v39 }
 0x28d   :  { %v4760_v19 = vadd.f32 %v1477_v48, %v1454_v36  ;;  %v2469_v34 = vmul.f32 -1.442695, %v4755_v56 }
 0x28e   :  { %v1436_v25 = vmul.f32 %v1422_v50, %v1404_v17  ;;  %v1331_v31 = vpop.permute.xlu1 %1330  ;;  %v1439_v32 = vmul.f32 %v1422_v50, %v1407_v42 }
 0x28f   :  { %v2470_v49 = vmul.f32 -1.442695, %v4760_v19  ;;  %2791 = vpow2.f32 %v2469_v34 }
 0x290   :  { %v1452_v40 = vadd.f32 %v1436_v25, %v1316_v9  ;;  %v1455_v38 = vadd.f32 %v1439_v32, %v1319_v15 }
 0x292   :  { %v1339_v46 = vpop.permute.xlu1 %1338  ;;  %v4758_v12 = vadd.f32 %v1477_v48, %v1452_v40 }
 0x293   :  { %v1368_v10 = vsel %vm1356_vm8, %v1331_v31, %v1339_v46 }
 0x294   :  { %v1408_v35 = vmul.f32 %v4484_v3, %v1368_v10  ;;  %v2468_v4 = vmul.f32 -1.442695, %v4758_v12  ;;  %v4769_v3 = vadd.f32 %v1477_v48, %v1455_v38 }
 0x296   :  { %v1440_v28 = vmul.f32 %v4599_v59, %v1408_v35  ;;  %v1347_v9 = vpop.permute.xlu1 %1346  ;;  %2793 = vpow2.f32 %v2468_v4  ;;  %v2471_v26 = vmul.f32 -1.442695, %v4769_v3 }
 0x297   :  { %v1364_v6 = vsel %vm1356_vm8, %v1339_v46, %v1347_v9  ;;  %2795 = vpow2.f32 %v2470_v49 }
 0x298   :  { %v1456_v13 = vadd.f32 %v1440_v28, %v4681_v20  ;;  %v1409_v62 = vmul.f32 %v4489_v55, %v1364_v6  ;;  %2797 = vpow2.f32 %v2471_v26 }
 0x29a   :  { %v1441_v60 = vmul.f32 %v4599_v59, %v1409_v62  ;;  %v1355_v54 = vpop.permute.xlu1 %1354 }
 0x29b   :  { %v1360_v43 = vsel %vm1356_vm8, %v1347_v9, %v1355_v54  ;;  %v1372_v30 = vsel %vm1356_vm8, %v1355_v54, %v1331_v31 }
 0x29c   :  { %v1457_v20 = vadd.f32 %v1441_v60, %v4683_v2  ;;  %v1410_v55 = vmul.f32 %v4496_v57, %v1360_v43  ;;  %v1411_v37 = vmul.f32 %v4499_v27, %v1372_v30  ;;  %v2792_v22 = vpop.eup %2791 }
 0x29d   :  { %v1557_v29 = vadd.f32 1.0, %v2792_v22 }
 0x29e   :  { %v1442_v7 = vmul.f32 %v4599_v59, %v1410_v55  ;;  %v1443_v50 = vmul.f32 %v4599_v59, %v1411_v37  ;;  %v1482_v16 = vpop.permute.xlu1 %1481 }
 0x29f   :  { %v1496_v61 = vadd.f32 %v1482_v16, %v1456_v13  ;;  %v1497_v1 = vadd.f32 %v1482_v16, %v1457_v20 }
 0x2a0   :  { %v1458_v58 = vadd.f32 %v1442_v7, %v4685_v0  ;;  %v1459_v21 = vadd.f32 %v1443_v50, %v4687_v52 }
 0x2a1   :  { %v2472_v2 = vmul.f32 -1.442695, %v1496_v61  ;;  %v2473_v8 = vmul.f32 -1.442695, %v1497_v1 }
 0x2a2   :  { %v1498_v57 = vadd.f32 %v1482_v16, %v1458_v58  ;;  %v1499_v27 = vadd.f32 %v1482_v16, %v1459_v21 }
 0x2a3   :  { %2799 = vpow2.f32 %v2472_v2  ;;  %v2794_v59 = vpop.eup %2793 }
 0x2a4   :  { %2801 = vpow2.f32 %v2473_v8  ;;  %v2474_v5 = vmul.f32 -1.442695, %v1498_v57  ;;  %v2475_v45 = vmul.f32 -1.442695, %v1499_v27  ;;  %v2796_v39 = vpop.eup %2795  ;;  %v1556_v17 = vadd.f32 1.0, %v2794_v59 }
 0x2a5   :  { %v2798_v42 = vpop.eup %2797  ;;  %v1558_v0 = vadd.f32 1.0, %v2796_v39 }
 0x2a6   :  { %2803 = vpow2.f32 %v2474_v5  ;;  %v1559_v47 = vadd.f32 1.0, %v2798_v42 }
 0x2a7   :  { %2805 = vpow2.f32 %v2475_v45 }
 0x2a8   :  { %2807 = vrcp.f32 %v1557_v29 }
 0x2a9   :  { %2809 = vrcp.f32 %v1556_v17 }
 0x2aa   :  { %2811 = vrcp.f32 %v1558_v0 }
 0x2b0   :  { %v2800_v14 = vpop.eup %2799 }
 0x2b1   :  { %v2802_v52 = vpop.eup %2801  ;;  %v1560_v63 = vadd.f32 1.0, %v2800_v14 }
 0x2b2   :  { %v1561_v25 = vadd.f32 1.0, %v2802_v52 }
 0x2b3   :  { %v2804_v31 = vpop.eup %2803  ;;  %2813 = vrcp.f32 %v1560_v63 }
 0x2b4   :  { %v2806_v11 = vpop.eup %2805  ;;  %v1562_v40 = vadd.f32 1.0, %v2804_v31  ;;  %2815 = vrcp.f32 %v1561_v25 }
 0x2b5   :  { %v1563_v48 = vadd.f32 1.0, %v2806_v11  ;;  %2817 = vrcp.f32 %v1559_v47  ;;  %v2808_v32 = vpop.eup %2807 }
 0x2b6   :  { %2819 = vrcp.f32 %v1562_v40  ;;  %v2810_v36 = vpop.eup %2809  ;;  %v4791_v9 = vmul.f32 %v2808_v32, %v4755_v56  ;;  %v5204_v32 = vmov 0  }
 0x2b7   :  { %2821 = vrcp.f32 %v1563_v48  ;;  %v2812_v46 = vpop.eup %2811  ;;  %v4786_v35 = vmul.f32 %v2810_v36, %v4758_v12  ;;  %v1978_v48 = vld [vmem:[%s4881_s6] sm:$0x1] }
 0x2b8   :  { %v4798_v4 = vmul.f32 %v2812_v46, %v4760_v19  ;;  %v2887_v19 = vmov 0.0   ;;  %v2693_v36 = vld [vmem:[%s4882_s7] sm:$0xff]  }
 0x2b9   :  { %2589 = vmatprep.subr.bf16.mxu0 %v2887_v19 }
 0x2c0   :  { %v2814_v15 = vpop.eup %2813 }
 0x2c1   :  { %v2816_v10 = vpop.eup %2815  ;;  %v4788_v38 = vmul.f32 %v2814_v15, %v1496_v61 }
 0x2c2   :  { %v2818_v28 = vpop.eup %2817  ;;  %v4793_v6 = vmul.f32 %v2816_v10, %v1497_v1 }
 0x2c3   :  { %v2820_v34 = vpop.eup %2819  ;;  %v1616_v13 = vpack.c.bf16 %v4788_v38, %v4786_v35  ;;  %v4805_v60 = vmul.f32 %v2818_v28, %v4769_v3 }
 0x2c4   :  { %v2822_v62 = vpop.eup %2821  ;;  %v1617_v12 = vpack.c.bf16 %v4793_v6, %v4791_v9  ;;  %v4802_v49 = vmul.f32 %v2820_v34, %v1498_v57 }
 0x2c5   :  { %v4807_v56 = vmul.f32 %v2822_v62, %v1499_v27 }
 0x2c6   :  { %1916 = vmatprep.mubr.bf16.mxu0 %v1617_v12  ;;  %v1618_v54 = vpack.c.bf16 %v4802_v49, %v4798_v4 }
 0x2c7   :  { %1917 = vmatmul.mubr.bf16.gmra.mxu0 %v1616_v13  ;;  %v1619_v43 = vpack.c.bf16 %v4807_v56, %v4805_v60 }
 0x2c8   :  { %2593 = vmatprep.mubr.msk.bf16.mxu0 %vm2888_vm10, %v2887_v19 }
 0x2c9   :  { %1965 = vmatprep.mubr.bf16.mxu1 %v1619_v43 }
 0x2ca   :  { %1966 = vmatmul.mubr.bf16.gmra.mxu1 %v1618_v54 }
 0x2cb   :  { %2599 = vmatprep.mubr.msk.bf16.mxu1 %vm2047_vm12, %v2693_v36 }
 0x347   :  { %v2543_v30 = vpop.f32.mrf.mxu0 }
 0x349   :  { %v2571_v20 = vpop.f32.mrf.mxu1  ;;  %v2544_v3 = vpop.f32.mrf.mxu0 }
 0x34a   :  { %v2545_v22 = vadd.f32 %v2544_v3, %v2543_v30  ;;  %v2694_v30 = vld [vmem:[%s4882_s7 + $0x8] sm:$0xff]   ;;  %v2889_v3 = vmov 1966171168  }
 0x34b   :  { %v2572_v55 = vpop.f32.mrf.mxu1  ;;  %v2546_v37 = vpop.f32.mrf.mxu0 }
 0x34c   :  { %v2573_v39 = vadd.f32 %v2572_v55, %v2571_v20  ;;  %v2518_v20 = vld.sshfl [vmem:[%s4884_s9] sm:$0x33 pattern:$0x75316420]  ;;  %v2144_v55 = vunpack.c.l.s4 %v2889_v3 }
 0x34d   :  { %v2574_v26 = vpop.f32.mrf.mxu1  ;;  %v2547_v7 = vpop.f32.mrf.mxu0 }
 0x34e   :  { %v2548_v27 = vadd.f32 %v2547_v7, %v2546_v37  ;;  %v1960_v52 = vadd.f32 %v2573_v39, %v2545_v22  ;;  %v2142_v37 = vcombine.high %v2518_v20, %v2518_v20  ;;  %v5205_v7 = vld [vmem:[#allocation55_spill] sm:$0xff] }
 0x34f   :  { %v2575_v16 = vpop.f32.mrf.mxu1 }
 0x350   :  { %v2576_v5 = vadd.f32 %v2575_v16, %v2574_v26  ;;  %v1974_v11 = vmul.f32 0.00390625, %v1960_v52  ;;  %v2145_v26 = vunpack.c.0.s8 %v2144_v55 }
 0x352   :  { %v1963_v0 = vadd.f32 %v2576_v5, %v2548_v27 }
 0x354   :  { %v1975_v25 = vmul.f32 0.00390625, %v1963_v0 }
 0x356   :  { %v1979_v40 = vpack.c.bf16 %v1975_v25, %v1974_v11 }
 0x387   :  { %v2549_v50 = vpop.f32.mrf.mxu0 }
 0x389   :  { %v2550_v61 = vpop.f32.mrf.mxu0 }
 0x38a   :  { %v2577_v1 = vpop.f32.mrf.mxu1  ;;  %v2551_v45 = vadd.f32 %v2550_v61, %v2549_v50  ;;  %v2148_v50 = vsub.s32 %v2145_v26, %v5205_v7 }
 0x38b   :  { %v2552_v58 = vpop.f32.mrf.mxu0 }
 0x38c   :  { %v2578_v21 = vpop.f32.mrf.mxu1  ;;  %v2156_v16 = vrot.slane %v2142_v37, %v2148_v50  ;;  %v2149_v61 = vrot.slane %v2518_v20, %v2148_v50 }
 0x38d   :  { %v2579_v2 = vadd.f32 %v2578_v21, %v2577_v1  ;;  %v2553_v8 = vpop.f32.mrf.mxu0 }
 0x38e   :  { %v2580_v57 = vpop.f32.mrf.mxu1  ;;  %v2554_v17 = vadd.f32 %v2553_v8, %v2552_v58  ;;  %v2158_v1 = vcombine.high %v2156_v16, %v2156_v16  ;;  %v2166_v58 = vsel %vm2054_vm13, %v2149_v61, 0  ;;  %v2157_v21 = vcombine.high %v2149_v61, %v2149_v61 }
 0x38f   :  { %v1968_v29 = vadd.f32 %v2579_v2, %v2551_v45 }
 0x390   :  { %v2581_v59 = vpop.f32.mrf.mxu1  ;;  %v2172_v2 = vsel %vm2054_vm13, %v2157_v21, 0 }
 0x391   :  { %v2582_v42 = vadd.f32 %v2581_v59, %v2580_v57  ;;  %v1976_v63 = vmul.f32 0.00390625, %v1968_v29 }
 0x393   :  { %v1971_v14 = vadd.f32 %v2582_v42, %v2554_v17 }
 0x395   :  { %v1977_v47 = vmul.f32 0.00390625, %v1971_v14 }
 0x397   :  { %v1980_v31 = vpack.c.bf16 %v1977_v47, %v1976_v63 }
 0x399   :  { %2590 = vmatpush3.bf16.msra.mxu0 %v1980_v31 }
 0x39a   :  { %2591 = vmatprep.subr.bf16.mxu0 %v2887_v19 }
 0x39d   :  { %2592 = vmatpush3.bf16.msra.mxu0 %v1979_v40 }
 0x39e   :  { %2519 = vmatprep.subr.msk.bf16.mxu0 %vm2054_vm13, %v2156_v16 }
 0x3a0   :  { %2594 = vmatmul.mubr.msk.bf16.vlgmr.msra.gmra.mxu0 %vm1981_vm11, %v1978_v48 }
 0x3a1   :  { %2209 = vmatprep.mubr.bf16.mxu0 %v5204_v32  ;;  %2192 = vmatpush1.bf16.msra.mxu0 %v2166_v58 }
 0x460   :  { %v2019_v46 = vpop.f32.mrf.mxu0 }
 0x461   :  { %v2509_v15 = vmul.f32 -1.442695, %v2019_v46 }
 0x462   :  { %v2595_v10 = vpop.f32.mrf.mxu0 }
 0x463   :  { %2823 = vpow2.f32 %v2509_v15 }
 0x464   :  { %v2022_v28 = vpop.f32.mrf.mxu0 }
 0x466   :  { %v2596_v34 = vpop.f32.mrf.mxu0 }
 0x470   :  { %v2824_v13 = vpop.eup %2823 }
 0x471   :  { %v2028_v62 = vadd.f32 1.0, %v2824_v13 }
 0x473   :  { %2825 = vrcp.f32 %v2028_v62 }
 0x480   :  { %v2826_v12 = vpop.eup %2825 }
 0x481   :  { %v2031_v54 = vmul.f32 %v2826_v12, %v2019_v46 }
 0x483   :  { %v2036_v43 = vpack.c.bf16 %v2031_v54, %v2031_v54 }
 0x485   :  { %2603 = vmatprep.subr.msk.bf16.mxu1 %vm2054_vm13, %v2036_v43  ;;  %v2056_v19 = vsel %vm2054_vm13, %v2036_v43, 0 }
 0x486   :  { %2598 = vmatpush3.bf16.msra.mxu1 %v2056_v19 }
 0x487   :  { %2522 = vmatprep.subr.msk.bf16.mxu1 %vm2054_vm13, %v2158_v1 }
 0x489   :  { %2600 = vmatmul.mubr.msk.bf16.vlgmr.msra.gmra.mxu1 %vm2047_vm12, %v2694_v30 }
 0x48a   :  { %2262 = vmatprep.mubr.bf16.mxu1 %v5204_v32  ;;  %2245 = vmatpush1.bf16.msra.mxu1 %v2172_v2 }
 0x549   :  { %v2601_v8 = vpop.f32.mrf.mxu1 }
 0x54a   :  { %v2516_v39 = vmul.f32 -1.442695, %v2601_v8 }
 0x54b   :  { %v2092_v57 = vpop.f32.mrf.mxu1 }
 0x54c   :  { %v2514_v27 = vmul.f32 -1.442695, %v2092_v57 }
 0x54d   :  { %v2602_v5 = vpop.f32.mrf.mxu1 }
 0x54e   :  { %2827 = vpow2.f32 %v2514_v27  ;;  %v2517_v22 = vmul.f32 -1.442695, %v2602_v5 }
 0x54f   :  { %v2095_v45 = vpop.f32.mrf.mxu1 }
 0x550   :  { %v2515_v59 = vmul.f32 -1.442695, %v2095_v45 }
 0x552   :  { %2829 = vpow2.f32 %v2515_v59 }
 0x553   :  { %2831 = vpow2.f32 %v2517_v22 }
 0x554   :  { %2833 = vpow2.f32 %v2516_v39 }
 0x55b   :  { %v2828_v29 = vpop.eup %2827 }
 0x55c   :  { %v2119_v17 = vadd.f32 1.0, %v2828_v29 }
 0x55e   :  { %2835 = vrcp.f32 %v2119_v17 }
 0x55f   :  { %v2830_v42 = vpop.eup %2829 }
 0x560   :  { %v2120_v0 = vadd.f32 1.0, %v2830_v42  ;;  %v2832_v14 = vpop.eup %2831 }
 0x561   :  { %v2834_v52 = vpop.eup %2833  ;;  %v2122_v63 = vadd.f32 1.0, %v2832_v14 }
 0x562   :  { %2837 = vrcp.f32 %v2120_v0  ;;  %v2121_v47 = vadd.f32 1.0, %v2834_v52 }
 0x563   :  { %2839 = vrcp.f32 %v2122_v63 }
 0x564   :  { %2841 = vrcp.f32 %v2121_v47 }
 0x56b   :  { %v2836_v25 = vpop.eup %2835 }
 0x56f   :  { %v2838_v31 = vpop.eup %2837 }
 0x570   :  { %v2131_v11 = vpack.c.bf16 %v2838_v31, %v2836_v25  ;;  %v2840_v40 = vpop.eup %2839 }
 0x571   :  { %v2842_v48 = vpop.eup %2841 }
 0x572   :  { %2520 = vmatmul.mubr.msk.bf16.vlgmr.msra.gmra.mxu0 %vm2047_vm12, %v2131_v11  ;;  %2523 = vmatmul.mubr.msk.bf16.vlgmr.msra.gmra.mxu1 %vm2047_vm12, %v2131_v11  ;;  %v2132_v36 = vpack.c.bf16 %v2840_v40, %v2842_v48 }
 0x573   :  { %2219 = vmatprep.mubr.bf16.mxu0 %v5204_v32  ;;  %2272 = vmatprep.mubr.bf16.mxu1 %v5204_v32 }
 0x57a   :  { %2521 = vmatmul.mubr.msk.bf16.gmra.mxu0 %vm2047_vm12, %v2132_v36  ;;  %2524 = vmatmul.mubr.msk.bf16.gmra.mxu1 %vm2047_vm12, %v2132_v36 }
 0x57b   :  { %2349 = vmatprep.mubr.bf16.mxu0 %v5204_v32  ;;  %2390 = vmatprep.mubr.bf16.mxu1 %v5204_v32 }
 0x632   :  { %v2211_v46 = vpop.f32.mrf.mxu0  ;;  %v2264_v15 = vpop.f32.mrf.mxu1 }
 0x634   :  { %v2213_v10 = vpop.f32.mrf.mxu0  ;;  %v2266_v28 = vpop.f32.mrf.mxu1 }
 0x636   :  { %v2215_v34 = vpop.f32.mrf.mxu0  ;;  %v2268_v13 = vpop.f32.mrf.mxu1 }
 0x637   :  { %v2287_v8 = vmul.f32 %v2215_v34, %v4707_v53  ;;  %v2307_v53 = vld [vmem:[%s4885_s10] sm:$0xf]  ;;  %s2890_s10 = smov [#allocation2]  }
 0x638   :  { %v2217_v62 = vpop.f32.mrf.mxu0  ;;  %v2270_v12 = vpop.f32.mrf.mxu1  ;;  %s2417_s25 = sshll.u32 %s2890_s10, 4  ;;  %s2418_s25 = int_to_ptr.vmem [resolvable:$true] %s2417_s25 }
 0x639   :  { %v2288_v55 = vmul.f32 %v2217_v62, %v4713_v23  ;;  %v2290_v37 = vmul.f32 %v2270_v12, %v4729_v51  ;;  %v2284_v51 = vmul.f32 %v2213_v10, %v4701_v41  ;;  %p2853_p1 = scmp.lt.s32.totalorder %s2418_s25, %s2418_s25 }
 0x63a   :  { %v2221_v54 = vpop.f32.mrf.mxu0  ;;  %v2274_v43 = vpop.f32.mrf.mxu1 }
 0x63b   :  { %v2291_v21 = vmul.f32 %v2221_v54, %v4786_v35  ;;  %v2293_v23 = vmul.f32 %v2274_v43, %v4798_v4  ;;  %v2300_v27 = vpack.c.bf16 %v2288_v55, %v2284_v51  ;;  %v2283_v35 = vmul.f32 %v2211_v46, %v4694_v24  ;;  %v2846_v24 = vld [vmem:[%s4875_s0] sm:$0xff] }
 0x63c   :  { %v2223_v19 = vpop.f32.mrf.mxu0  ;;  %v2276_v30 = vpop.f32.mrf.mxu1  ;;  %v2285_v4 = vmul.f32 %v2264_v15, %v4704_v44  ;;  %v2399_v44 = vunpack.c.l.bf16 %v2846_v24  ;;  %v2400_v29 = vunpack.c.h.bf16 %v2846_v24 }
 0x63d   :  { %v2292_v16 = vmul.f32 %v2223_v19, %v4791_v9  ;;  %v2294_v61 = vmul.f32 %v2276_v30, %v4805_v60  ;;  %v2289_v9 = vmul.f32 %v2268_v13, %v4719_v33  ;;  %v2299_v41 = vpack.c.bf16 %v2287_v8, %v2283_v35  ;;  %v2312_v33 = vpop.permute.xlu1 %2311 }
 0x63e   :  { %v2225_v20 = vpop.f32.mrf.mxu0  ;;  %v2278_v3 = vpop.f32.mrf.mxu1 }
 0x63f   :  { %v2295_v32 = vmul.f32 %v2225_v20, %v4788_v38  ;;  %v2297_v26 = vmul.f32 %v2278_v3, %v4802_v49  ;;  %v2286_v38 = vmul.f32 %v2266_v28, %v4716_v18  ;;  %v2301_v18 = vpack.c.bf16 %v2289_v9, %v2285_v4 }
 0x640   :  { %v2227_v7 = vpop.f32.mrf.mxu0  ;;  %v2280_v50 = vpop.f32.mrf.mxu1 }
 0x641   :  { %v2296_v1 = vmul.f32 %v2227_v7, %v4793_v6  ;;  %v2298_v58 = vmul.f32 %v2280_v50, %v4807_v56  ;;  %v2303_v57 = vpack.c.bf16 %v2295_v32, %v2291_v21  ;;  %v2305_v60 = vpack.c.bf16 %v2297_v26, %v2293_v23  ;;  %v2847_v56 = vld [vmem:[%s4875_s0 + $0x8] sm:$0xff]  ;;  %s2848_s0 = scalar_lea.vmem %s2418_s25, 512 }
 0x642   :  { %v2302_v6 = vpack.c.bf16 %v2290_v37, %v2286_v38  ;;  %v2401_v5 = vunpack.c.l.bf16 %v2847_v56  ;;  %v2402_v17 = vunpack.c.h.bf16 %v2847_v56  ;;  %p2849_p0 = scmp.ne.s32.totalorder %s2418_s25, %s2848_s0  ;;  %p2854_p2 = scmp.lt.s32.totalorder %s2848_s0, %s2848_s0 }
 0x643   :  { %v2304_v2 = vpack.c.bf16 %v2296_v1, %v2292_v16  ;;  %v2306_v49 = vpack.c.bf16 %v2298_v58, %v2294_v61 }
 0x644   :  { %p2855_p3 = por %p2854_p2, %p2853_p1 }
 0x645   :  { %2329 = vmatprep.subr.bf16.mxu0 %v2304_v2  ;;  %2370 = vmatprep.subr.bf16.mxu1 %v2306_v49 }
 0x646   :  { %2330 = vmatpush1.bf16.msra.mxu0 %v2303_v57  ;;  %2371 = vmatpush1.bf16.msra.mxu1 %v2305_v60  ;;  %p2856_p4 = pnand %p2855_p3, %p2849_p0 }
 0x647   :  { %2331 = vmatprep.subr.bf16.mxu0 %v2300_v27  ;;  %2372 = vmatprep.subr.bf16.mxu1 %v2302_v6 }
 0x64a   :  { %2332 = vmatpush1.bf16.msra.mxu0 %v2299_v41  ;;  %2373 = vmatpush1.bf16.msra.mxu1 %v2301_v18 }
 0x64d   :  { %2525 = vmatmul.mubr.msk.bf16.vlgmr.msra.gmra.mxu0 %vm1981_vm11, %v2307_v53  ;;  %2526 = vmatmul.mubr.msk.bf16.vlgmr.msra.gmra.mxu1 %vm1981_vm11, %v2307_v53 }
 0x70d   :  { %v2351_v45 = vpop.f32.mrf.mxu0  ;;  %v2392_v22 = vpop.f32.mrf.mxu1 }
 0x70e   :  { %v2352_v59 = vadd.f32 %v2351_v45, %v2312_v33  ;;  %v2393_v39 = vadd.f32 %v2392_v22, %v2312_v33 }
 0x70f   :  { %v2353_v42 = vpop.f32.mrf.mxu0  ;;  %v2394_v0 = vpop.f32.mrf.mxu1 }
 0x710   :  { %v2403_v14 = vadd.f32 %v2399_v44, %v2352_v59  ;;  %v2405_v52 = vadd.f32 %v2401_v5, %v2393_v39  ;;  %v2354_v63 = vadd.f32 %v2353_v42, %v2312_v33  ;;  %v2395_v47 = vadd.f32 %v2394_v0, %v2312_v33 }
 0x711   :  { %v2355_v25 = vpop.f32.mrf.mxu0  ;;  %v2396_v31 = vpop.f32.mrf.mxu1 }
 0x712   :  { %2407 = vst [vmem:[#allocation2] sm:$0xff] %v2403_v14  ;;  %2409 = vst [vmem:[#allocation2 + $0x10] sm:$0xff] %v2405_v52  ;;  %v2404_v11 = vadd.f32 %v2400_v29, %v2354_v63  ;;  %v2406_v40 = vadd.f32 %v2402_v17, %v2395_v47 }
 0x713   :  { %v2356_v48 = vpop.f32.mrf.mxu0  ;;  %v2397_v36 = vpop.f32.mrf.mxu1 }
 0x714   :  { %2408 = vst [vmem:[#allocation2 + $0x8] sm:$0xff] %v2404_v11  ;;  %2410 = vst [vmem:[#allocation2 + $0x18] sm:$0xff] %v2406_v40 }
 0x715   :  { %2859 = shalt.err (!%p2856_p4)
}
 0x716   :  { %2420 = dma.vmem_to_hbm [thread:$0]  %s2418_s25, 512, %s4887_s12, [#allocation3]  }
 0x717   :  { %2868 = dma.done.wait [#allocation3], 512  }
 0x718   :  { %2869 = vsyncadd [#allocation3], 4294966784 }
 0x719   :  { %2424 = vsyncpa [#allocation3], 1 }

</bundles_post_ra>
